<compile_context>
chip_gen: v7x
topology: tpu7x:2x2x1
jax: 0.10.0
libtpu: 0.0.40
codegen_flags: <defaults>
</compile_context>

<pallas_src>
import functools

import jax
import jax.numpy as jnp
from jax import lax
from jax.experimental import pallas as pl
from jax.experimental.pallas import tpu as pltpu

ACT_DTYPE = jnp.bfloat16     # activation / weight dtype fed to the MXU
LN_EPS = 1e-5                # matches HF CLIPTextModel


# ----------------------------- helpers --------------------------------------

def _pick_tile(n, max_tile=1152, min_steps=2):
    """Largest multiple of 128 <= max_tile dividing n with >= min_steps grid
    steps (so weight DMA double-buffers); else any dividing multiple of 128;
    else the full n (single step)."""
    best = None
    for t in range(128, min(max_tile, n) + 1, 128):
        if n % t == 0 and n // t >= min_steps:
            best = t
    if best is not None:
        return best
    for t in range(min(max_tile, n), 127, -128):
        if n % t == 0:
            return t
    return n


def _attn_heads_per_group(num_heads, head_dim):
    """Smallest divisor g of num_heads whose lane width g*head_dim is a
    multiple of 128 (lane-dense attention blocks); falls back to one group of
    all heads (full-width blocks) when no such divisor exists."""
    for g in range(1, num_heads):
        if num_heads % g == 0 and (g * head_dim) % 128 == 0:
            return g
    return num_heads


def _layernorm_f32(x, g, b, eps):
    mu = jnp.mean(x, axis=-1, keepdims=True)
    var = jnp.mean((x - mu) * (x - mu), axis=-1, keepdims=True)
    return (x - mu) * lax.rsqrt(var + eps) * g + b


# ----------------------------- Pallas kernels ------------------------------

def _ln_linear_kernel(x_ref, g_ref, b_ref, w_ref, bias_ref, o_ref, xn_ref, *,
                      eps):
    # LayerNorm computed ONCE (first tile) into a bf16 VMEM scratch, reused for
    # every weight N-tile.  x: (M, K) bf16; g/b: (1, K) f32; w: (K, TN) bf16.
    @pl.when(pl.program_id(0) == 0)
    def _():
        x = x_ref[...].astype(jnp.float32)
        xn_ref[...] = _layernorm_f32(x, g_ref[...], b_ref[...], eps).astype(
            xn_ref.dtype)

    acc = jnp.dot(xn_ref[...], w_ref[...], preferred_element_type=jnp.float32)
    o_ref[...] = (acc + bias_ref[...]).astype(o_ref.dtype)


def _linear_residual_kernel(x_ref, w_ref, bias_ref, res_ref, o_ref):
    # GEMM with bias + residual fused into the epilogue (f32 accumulate).
    acc = jnp.dot(x_ref[...], w_ref[...], preferred_element_type=jnp.float32)
    acc = acc + bias_ref[...] + res_ref[...].astype(jnp.float32)
    o_ref[...] = acc.astype(o_ref.dtype)


def _mlp_block_kernel(x_ref, g_ref, b_ref, w1_ref, b1_ref, w2_ref, b2_ref,
                      o_ref, xn_ref, acc_ref, *, eps):
    # Fused LN2 -> fc1 -> quick_gelu -> fc2 -> +residual.  Grid tiles the MLP
    # hidden dim; fc2 partial products accumulate into an f32 VMEM scratch.
    j = pl.program_id(0)

    @pl.when(j == 0)
    def _():
        x = x_ref[...].astype(jnp.float32)
        xn_ref[...] = _layernorm_f32(x, g_ref[...], b_ref[...], eps).astype(
            xn_ref.dtype)
        # residual + fc2 bias, added exactly once
        acc_ref[...] = x + b2_ref[...]

    h = jnp.dot(xn_ref[...], w1_ref[...], preferred_element_type=jnp.float32)
    h = h + b1_ref[...]
    h = h * jax.nn.sigmoid(1.702 * h)                       # quick_gelu (f32)
    acc_ref[...] += jnp.dot(h.astype(w2_ref.dtype), w2_ref[...],
                            preferred_element_type=jnp.float32)

    @pl.when(j == pl.num_programs(0) - 1)
    def _():
        o_ref[...] = acc_ref[...].astype(o_ref.dtype)


def _causal_mha_kernel(qkv_ref, o_ref, *, heads_per_group, head_dim):
    # One (batch, head-group) per grid step.  The fused QKV weight columns are
    # permuted so this group's [Q | K | V] slab is contiguous: (S, 3*g*Dh).
    # Scale is already folded into the Q projection.
    S = qkv_ref.shape[1]
    g = heads_per_group
    gD = g * head_dim
    slab = qkv_ref[0]                                       # (S, 3*gD) bf16

    row = lax.broadcasted_iota(jnp.int32, (S, S), 0)
    col = lax.broadcasted_iota(jnp.int32, (S, S), 1)
    causal = col <= row

    outs = []
    for h in range(g):
        lo = h * head_dim
        hi = lo + head_dim
        q = slab[:, lo:hi]                                  # (S, Dh) bf16
        k = slab[:, gD + lo:gD + hi]
        v = slab[:, 2 * gD + lo:2 * gD + hi]
        # contract last axes directly -> no k transpose / XLU work
        s = lax.dot_general(q, k, (((1,), (1,)), ((), ())),
                            preferred_element_type=jnp.float32)   # (S, S) f32
        s = jnp.where(causal, s, jnp.float32(-1e9))
        s = s - jnp.max(s, axis=-1, keepdims=True)
        p = jnp.exp(s)
        p = p / jnp.sum(p, axis=-1, keepdims=True)
        outs.append(jnp.dot(p.astype(v.dtype), v,
                            preferred_element_type=jnp.float32))
    out = outs[0] if g == 1 else jnp.concatenate(outs, axis=-1)
    o_ref[0] = out.astype(o_ref.dtype)                      # one dense store


def _layernorm_kernel(x_ref, g_ref, b_ref, o_ref, *, eps):
    x = x_ref[...].astype(jnp.float32)
    o_ref[...] = _layernorm_f32(x, g_ref[...], b_ref[...], eps).astype(
        o_ref.dtype)


# ----------------------------- wrappers -------------------------------------

def pallas_ln_linear(x, g, b, w, bias):
    # x: (M, K) bf16 ; w: (K, N) bf16 ; g/b/bias: f32
    M, K = x.shape
    N = w.shape[1]
    tn = _pick_tile(N)
    return pl.pallas_call(
        functools.partial(_ln_linear_kernel, eps=LN_EPS),
        out_shape=jax.ShapeDtypeStruct((M, N), x.dtype),
        grid=(N // tn,),
        in_specs=[
            pl.BlockSpec((M, K), lambda j: (0, 0)),
            pl.BlockSpec((1, K), lambda j: (0, 0)),
            pl.BlockSpec((1, K), lambda j: (0, 0)),
            pl.BlockSpec((K, tn), lambda j: (0, j)),
            pl.BlockSpec((1, tn), lambda j: (0, j)),
        ],
        out_specs=pl.BlockSpec((M, tn), lambda j: (0, j)),
        scratch_shapes=[pltpu.VMEM((M, K), ACT_DTYPE)],
        compiler_params=pltpu.CompilerParams(
            dimension_semantics=("arbitrary",)),   # LN hoist assumes seq order
    )(x, g.reshape(1, K), b.reshape(1, K), w, bias.reshape(1, N))


def pallas_linear_residual(x, w, bias, res):
    # x: (M, K) bf16 ; w: (K, N) bf16 ; res: (M, N) bf16 ; bias: (N,) f32
    M, K = x.shape
    N = w.shape[1]
    tn = _pick_tile(N, max_tile=768)
    return pl.pallas_call(
        _linear_residual_kernel,
        out_shape=jax.ShapeDtypeStruct((M, N), x.dtype),
        grid=(N // tn,),
        in_specs=[
            pl.BlockSpec((M, K), lambda j: (0, 0)),
            pl.BlockSpec((K, tn), lambda j: (0, j)),
            pl.BlockSpec((1, tn), lambda j: (0, j)),
            pl.BlockSpec((M, tn), lambda j: (0, j)),
        ],
        out_specs=pl.BlockSpec((M, tn), lambda j: (0, j)),
        compiler_params=pltpu.CompilerParams(
            dimension_semantics=("parallel",)),
    )(x, w, bias.reshape(1, N), res)


def pallas_mlp_block(x, g, b, w1, b1, w2, b2):
    # Fused LN2 -> fc1 -> quick_gelu -> fc2 -> +residual (x is the residual).
    M, D = x.shape
    F = w1.shape[1]
    tf = _pick_tile(F)
    return pl.pallas_call(
        functools.partial(_mlp_block_kernel, eps=LN_EPS),
        out_shape=jax.ShapeDtypeStruct((M, D), x.dtype),
        grid=(F // tf,),
        in_specs=[
            pl.BlockSpec((M, D), lambda j: (0, 0)),
            pl.BlockSpec((1, D), lambda j: (0, 0)),
            pl.BlockSpec((1, D), lambda j: (0, 0)),
            pl.BlockSpec((D, tf), lambda j: (0, j)),
            pl.BlockSpec((1, tf), lambda j: (0, j)),
            pl.BlockSpec((tf, D), lambda j: (j, 0)),
            pl.BlockSpec((1, D), lambda j: (0, 0)),
        ],
        out_specs=pl.BlockSpec((M, D), lambda j: (0, 0)),
        scratch_shapes=[pltpu.VMEM((M, D), ACT_DTYPE),
                        pltpu.VMEM((M, D), jnp.float32)],
        compiler_params=pltpu.CompilerParams(
            dimension_semantics=("arbitrary",)),
    )(x, g.reshape(1, D), b.reshape(1, D), w1, b1.reshape(1, F), w2,
      b2.reshape(1, D))


def pallas_causal_mha(qkv, num_heads):
    # qkv: (B, S, 3D) bf16 with per-head-group [Q|K|V] column layout.
    B, S, threeD = qkv.shape
    D = threeD // 3
    Dh = D // num_heads
    g = _attn_heads_per_group(num_heads, Dh)
    n_groups = num_heads // g
    return pl.pallas_call(
        functools.partial(_causal_mha_kernel, heads_per_group=g, head_dim=Dh),
        out_shape=jax.ShapeDtypeStruct((B, S, D), qkv.dtype),
        grid=(B, n_groups),
        in_specs=[pl.BlockSpec((1, S, 3 * g * Dh), lambda b, gi: (b, 0, gi))],
        out_specs=pl.BlockSpec((1, S, g * Dh), lambda b, gi: (b, 0, gi)),
        compiler_params=pltpu.CompilerParams(
            dimension_semantics=("parallel", "parallel")),
    )(qkv)


def pallas_layernorm(x, g, b, out_dtype=None):
    M, D = x.shape
    out_dtype = x.dtype if out_dtype is None else out_dtype
    return pl.pallas_call(
        functools.partial(_layernorm_kernel, eps=LN_EPS),
        out_shape=jax.ShapeDtypeStruct((M, D), out_dtype),
    )(x, g.reshape(1, D), b.reshape(1, D))


# ----------------------------- model ----------------------------------------

def clip_text_forward(params, token_ids, num_heads):
    B, S = token_ids.shape
    D = params["tok_emb"].shape[1]

    # embedding lookups are gather glue (kept in plain JAX)
    x = params["tok_emb"][token_ids] + params["pos_emb"][:S][None, :, :]

    # pad S so every vreg / score tile is dense; pad rows are causal-only
    # garbage that never influences real rows and is sliced off at the end.
    S_pad = -(-S // 8) * 8
    if S_pad != S:
        x = jnp.pad(x, ((0, 0), (0, S_pad - S), (0, 0)))
    M = B * S_pad
    x2 = x.astype(ACT_DTYPE).reshape(M, D)                    # (M, D)

    for lyr in params["layers"]:
        # ---- attention block: LN1 -> fused QKV -> MHSA -> out-proj + res
        qkv = pallas_ln_linear(x2, lyr["ln1_g"], lyr["ln1_b"],
                               lyr["wqkv"], lyr["bqkv"])      # (M, 3D)
        o = pallas_causal_mha(qkv.reshape(B, S_pad, 3 * D), num_heads)
        x2 = pallas_linear_residual(o.reshape(M, D), lyr["wo"], lyr["bo"], x2)

        # ---- MLP block: fused LN2 -> fc1 -> quick_gelu -> fc2 -> +res
        x2 = pallas_mlp_block(x2, lyr["ln2_g"], lyr["ln2_b"],
                              lyr["w1"], lyr["b1"], lyr["w2"], lyr["b2"])

    z = pallas_layernorm(x2, params["lnf_g"], params["lnf_b"],
                         out_dtype=jnp.float32)
    return z.reshape(B, S_pad, D)[:, :S, :]                   # last_hidden_state


# ----------------------------- reference (pure JAX, f32) ---------------------

def clip_text_reference(raw, token_ids, num_heads):
    B, S = token_ids.shape
    D = raw["tok_emb"].shape[1]
    Dh = D // num_heads
    scale = Dh ** -0.5
    x = raw["tok_emb"][token_ids] + raw["pos_emb"][:S][None, :, :]
    mask = jnp.tril(jnp.ones((S, S), dtype=bool))

    def ln(v, g, b):
        mu = v.mean(-1, keepdims=True)
        var = ((v - mu) ** 2).mean(-1, keepdims=True)
        return (v - mu) / jnp.sqrt(var + LN_EPS) * g + b

    for l in raw["layers"]:
        h = ln(x, l["ln1_g"], l["ln1_b"])
        q = (h @ l["wq"] + l["bq"]) * scale
        k = h @ l["wk"] + l["bk"]
        v = h @ l["wv"] + l["bv"]
        q = q.reshape(B, S, num_heads, Dh).transpose(0, 2, 1, 3)
        k = k.reshape(B, S, num_heads, Dh).transpose(0, 2, 1, 3)
        v = v.reshape(B, S, num_heads, Dh).transpose(0, 2, 1, 3)
        s = jnp.einsum("bhqd,bhkd->bhqk", q, k)
        s = jnp.where(mask, s, -1e9)
        p = jax.nn.softmax(s, axis=-1)
        o = jnp.einsum("bhqk,bhkd->bhqd", p, v)
        o = o.transpose(0, 2, 1, 3).reshape(B, S, D)
        x = x + o @ l["wo"] + l["bo"]
        h = ln(x, l["ln2_g"], l["ln2_b"])
        h = h @ l["w1"] + l["b1"]
        h = h * jax.nn.sigmoid(1.702 * h)
        x = x + h @ l["w2"] + l["b2"]
    return ln(x, raw["lnf_g"], raw["lnf_b"])


# ----------------------------- parameter init / prep -------------------------

def init_params(key, vocab, max_len, hidden, mlp, num_layers):
    keys = jax.random.split(key, 2 + num_layers)
    p = {
        "tok_emb": 0.02 * jax.random.normal(keys[0], (vocab, hidden), jnp.float32),
        "pos_emb": 0.02 * jax.random.normal(keys[1], (max_len, hidden), jnp.float32),
        "lnf_g": jnp.ones((hidden,), jnp.float32),
        "lnf_b": jnp.zeros((hidden,), jnp.float32),
        "layers": [],
    }
    for li in range(num_layers):
        ks = jax.random.split(keys[2 + li], 6)
        s = 0.02
        p["layers"].append({
            "ln1_g": jnp.ones((hidden,), jnp.float32),
            "ln1_b": jnp.zeros((hidden,), jnp.float32),
            "wq": s * jax.random.normal(ks[0], (hidden, hidden), jnp.float32),
            "bq": jnp.zeros((hidden,), jnp.float32),
            "wk": s * jax.random.normal(ks[1], (hidden, hidden), jnp.float32),
            "bk": jnp.zeros((hidden,), jnp.float32),
            "wv": s * jax.random.normal(ks[2], (hidden, hidden), jnp.float32),
            "bv": jnp.zeros((hidden,), jnp.float32),
            "wo": s * jax.random.normal(ks[3], (hidden, hidden), jnp.float32),
            "bo": jnp.zeros((hidden,), jnp.float32),
            "ln2_g": jnp.ones((hidden,), jnp.float32),
            "ln2_b": jnp.zeros((hidden,), jnp.float32),
            "w1": s * jax.random.normal(ks[4], (hidden, mlp), jnp.float32),
            "b1": jnp.zeros((mlp,), jnp.float32),
            "w2": s * jax.random.normal(ks[5], (mlp, hidden), jnp.float32),
            "b2": jnp.zeros((hidden,), jnp.float32),
        })
    return p


def prepare_params(raw, num_heads):
    """Fuse QKV (scale folded into Q, columns permuted into per-head-group
    [Q|K|V] slabs) and cast weights to bf16."""
    hidden = raw["tok_emb"].shape[1]
    head_dim = hidden // num_heads
    scale = head_dim ** -0.5
    g = _attn_heads_per_group(num_heads, head_dim)
    p = {
        "tok_emb": raw["tok_emb"],
        "pos_emb": raw["pos_emb"],
        "lnf_g": raw["lnf_g"],
        "lnf_b": raw["lnf_b"],
        "layers": [],
    }
    for l in raw["layers"]:
        w_cols, b_cols = [], []
        for gi in range(num_heads // g):
            lo, hi = gi * g * head_dim, (gi + 1) * g * head_dim
            w_cols += [l["wq"][:, lo:hi] * scale, l["wk"][:, lo:hi],
                       l["wv"][:, lo:hi]]
            b_cols += [l["bq"][lo:hi] * scale, l["bk"][lo:hi], l["bv"][lo:hi]]
        wqkv = jnp.concatenate(w_cols, axis=1)
        bqkv = jnp.concatenate(b_cols, axis=0)
        p["layers"].append({
            "ln1_g": l["ln1_g"], "ln1_b": l["ln1_b"],
            "wqkv": wqkv.astype(ACT_DTYPE), "bqkv": bqkv.astype(jnp.float32),
            "wo": l["wo"].astype(ACT_DTYPE), "bo": l["bo"].astype(jnp.float32),
            "ln2_g": l["ln2_g"], "ln2_b": l["ln2_b"],
            "w1": l["w1"].astype(ACT_DTYPE), "b1": l["b1"].astype(jnp.float32),
            "w2": l["w2"].astype(ACT_DTYPE), "b2": l["b2"].astype(jnp.float32),
        })
    return p


# ----------------------------- main ------------------------------------------

if __name__ == "__main__":
    # small, CLIP-text-like config
    BATCH = 2
    SEQ = 8          # max_length analogue (77 in the real model)
    HIDDEN = 32      # 768 in the real model
    HEADS = 4        # 12 in the real model
    MLP = 128        # 4 * hidden
    LAYERS = 2       # 12 in the real model
    VOCAB = 64       # 49408 in the real model

    key = jax.random.PRNGKey(0)
    k_tok, k_param = jax.random.split(key)

    # pre-tokenized token ids (tokenizer itself is not translatable)
    token_ids = jax.random.randint(k_tok, (BATCH, SEQ), 0, VOCAB, dtype=jnp.int32)

    raw_params = init_params(k_param, VOCAB, SEQ, HIDDEN, MLP, LAYERS)
    params = prepare_params(raw_params, HEADS)

    fwd = jax.jit(functools.partial(clip_text_forward, num_heads=HEADS))
    z = fwd(params, token_ids)
    jax.block_until_ready(z)

    assert z.shape == (BATCH, SEQ, HIDDEN) and z.dtype == jnp.float32

    # loose sanity check against an f32 pure-JAX reference (bf16 drift expected)
    z_ref = clip_text_reference(raw_params, token_ids, HEADS)
    max_err = float(jnp.max(jnp.abs(z - z_ref)))
    assert max_err < 0.25, f"max abs error vs f32 reference: {max_err}"

    print("KERNEL_OK")
</pallas_src>

<mosaic_0001>
module attributes {stable_mosaic.version = 11 : i64} {
  func.func @_linear_residual_kernel(%arg0: i32, %arg1: memref<16x32xbf16, #tpu.memory_space<vmem>>, %arg2: memref<32x32xbf16, #tpu.memory_space<vmem>>, %arg3: memref<1x32xf32, #tpu.memory_space<vmem>>, %arg4: memref<16x32xbf16, #tpu.memory_space<vmem>>, %arg5: memref<16x32xbf16, #tpu.memory_space<vmem>>) attributes {dimension_semantics = [#tpu.dimension_semantics<parallel>], iteration_bounds = array<i64: 1>, scalar_prefetch = 0 : i64, scratch_operands = 0 : i64, tpu.core_type = #tpu.core_type<tc>, window_params = [{pipeline_mode = #tpu.pipeline_mode<synchronous>, transform_indices = @transform_0, window_bounds = array<i64: 16, 32>}, {transform_indices = @transform_1, window_bounds = array<i64: 32, 32>}, {transform_indices = @transform_2, window_bounds = array<i64: 1, 32>}, {transform_indices = @transform_3, window_bounds = array<i64: 16, 32>}, {transform_indices = @transform_4, window_bounds = array<i64: 16, 32>}]} {
    %c0 = arith.constant 0 : index
    %c0_0 = arith.constant 0 : index
    %0 = vector.load %arg1[%c0, %c0_0] : memref<16x32xbf16, #tpu.memory_space<vmem>>, vector<16x32xbf16>
    %c0_1 = arith.constant 0 : index
    %c0_2 = arith.constant 0 : index
    %1 = vector.load %arg2[%c0_1, %c0_2] : memref<32x32xbf16, #tpu.memory_space<vmem>>, vector<32x32xbf16>
    %cst = arith.constant dense<0.000000e+00> : vector<16x32xf32>
    %2 = tpu.matmul %0, %1, %cst {dimension_numbers = #tpu.dot_dimension_numbers<[1], [0], [0], [1], [0, 0, 1, 1], [], []>} : vector<16x32xbf16>, vector<32x32xbf16>, vector<16x32xf32> -> vector<16x32xf32>
    %c0_3 = arith.constant 0 : index
    %c0_4 = arith.constant 0 : index
    %3 = vector.load %arg3[%c0_3, %c0_4] : memref<1x32xf32, #tpu.memory_space<vmem>>, vector<1x32xf32>
    %4 = vector.broadcast %3 : vector<1x32xf32> to vector<16x32xf32>
    %5 = arith.addf %2, %4 : vector<16x32xf32>
    %c0_5 = arith.constant 0 : index
    %c0_6 = arith.constant 0 : index
    %6 = vector.load %arg4[%c0_5, %c0_6] : memref<16x32xbf16, #tpu.memory_space<vmem>>, vector<16x32xbf16>
    %7 = arith.extf %6 : vector<16x32xbf16> to vector<16x32xf32>
    %8 = arith.addf %5, %7 : vector<16x32xf32>
    %9 = arith.truncf %8 : vector<16x32xf32> to vector<16x32xbf16>
    %c0_7 = arith.constant 0 : index
    %c0_8 = arith.constant 0 : index
    %10 = vector.load %arg5[%c0_7, %c0_8] : memref<16x32xbf16, #tpu.memory_space<vmem>>, vector<16x32xbf16>
    tpu.vector_store %arg5[%c0_7, %c0_8], %9 {strides = array<i32>} : memref<16x32xbf16, #tpu.memory_space<vmem>>, vector<16x32xbf16>,
    return
  }
  func.func @transform_0(%arg0: i32) -> (i32, i32) {
    %c0_i32 = arith.constant 0 : i32
    %c0_i32_0 = arith.constant 0 : i32
    %c0_i32_1 = arith.constant 0 : i32
    return %c0_i32, %c0_i32_0 : i32, i32
  }
  func.func @transform_1(%arg0: i32) -> (i32, i32) {
    %c0_i32 = arith.constant 0 : i32
    %c0_i32_0 = arith.constant 0 : i32
    return %c0_i32, %arg0 : i32, i32
  }
  func.func @transform_2(%arg0: i32) -> (i32, i32) {
    %c0_i32 = arith.constant 0 : i32
    %c0_i32_0 = arith.constant 0 : i32
    return %c0_i32, %arg0 : i32, i32
  }
  func.func @transform_3(%arg0: i32) -> (i32, i32) {
    %c0_i32 = arith.constant 0 : i32
    %c0_i32_0 = arith.constant 0 : i32
    return %c0_i32, %arg0 : i32, i32
  }
  func.func @transform_4(%arg0: i32) -> (i32, i32) {
    %c0_i32 = arith.constant 0 : i32
    %c0_i32_0 = arith.constant 0 : i32
    return %c0_i32, %arg0 : i32, i32
  }
}

module attributes {stable_mosaic.version = 11 : i64} {
  func.func @_ln_linear_kernel(%arg0: i32, %arg1: memref<16x32xbf16, #tpu.memory_space<vmem>>, %arg2: memref<1x32xf32, #tpu.memory_space<vmem>>, %arg3: memref<1x32xf32, #tpu.memory_space<vmem>>, %arg4: memref<32x96xbf16, #tpu.memory_space<vmem>>, %arg5: memref<1x96xf32, #tpu.memory_space<vmem>>, %arg6: memref<16x96xbf16, #tpu.memory_space<vmem>>, %arg7: memref<16x32xbf16, #tpu.memory_space<vmem>>) attributes {dimension_semantics = [#tpu.dimension_semantics<arbitrary>], iteration_bounds = array<i64: 1>, scalar_prefetch = 0 : i64, scratch_operands = 1 : i64, tpu.core_type = #tpu.core_type<tc>, window_params = [{pipeline_mode = #tpu.pipeline_mode<synchronous>, transform_indices = @transform_0, window_bounds = array<i64: 16, 32>}, {pipeline_mode = #tpu.pipeline_mode<synchronous>, transform_indices = @transform_1, window_bounds = array<i64: 1, 32>}, {pipeline_mode = #tpu.pipeline_mode<synchronous>, transform_indices = @transform_2, window_bounds = array<i64: 1, 32>}, {transform_indices = @transform_3, window_bounds = array<i64: 32, 96>}, {transform_indices = @transform_4, window_bounds = array<i64: 1, 96>}, {transform_indices = @transform_5, window_bounds = array<i64: 16, 96>}]} {
    %c0_i32 = arith.constant 0 : i32
    %0 = arith.cmpi eq, %arg0, %c0_i32 : i32
    %1 = arith.extui %0 : i1 to i32
    %c0_i32_0 = arith.constant 0 : i32
    %2 = arith.cmpi ne, %1, %c0_i32_0 : i32
    scf.if %2 {
      %c0_8 = arith.constant 0 : index
      %c0_9 = arith.constant 0 : index
      %11 = vector.load %arg1[%c0_8, %c0_9] : memref<16x32xbf16, #tpu.memory_space<vmem>>, vector<16x32xbf16>
      %12 = arith.extf %11 : vector<16x32xbf16> to vector<16x32xf32>
      %c0_10 = arith.constant 0 : index
      %c0_11 = arith.constant 0 : index
      %13 = vector.load %arg2[%c0_10, %c0_11] : memref<1x32xf32, #tpu.memory_space<vmem>>, vector<1x32xf32>
      %c0_12 = arith.constant 0 : index
      %c0_13 = arith.constant 0 : index
      %14 = vector.load %arg3[%c0_12, %c0_13] : memref<1x32xf32, #tpu.memory_space<vmem>>, vector<1x32xf32>
      %cst_14 = arith.constant dense<0.000000e+00> : vector<16xf32>
      %15 = vector.multi_reduction <add>, %12, %cst_14 [1] : vector<16x32xf32> to vector<16xf32>
      %16 = vector.shape_cast %15 : vector<16xf32> to vector<16x1xf32>
      %cst_15 = arith.constant 3.200000e+01 : f32
      %17 = vector.broadcast %cst_15 : f32 to vector<16x1xf32>
      %18 = arith.divf %16, %17 : vector<16x1xf32>
      %19 = vector.broadcast %18 : vector<16x1xf32> to vector<16x32xf32>
      %20 = arith.subf %12, %19 : vector<16x32xf32>
      %21 = vector.broadcast %18 : vector<16x1xf32> to vector<16x32xf32>
      %22 = arith.subf %12, %21 : vector<16x32xf32>
      %23 = arith.mulf %20, %22 : vector<16x32xf32>
      %cst_16 = arith.constant dense<0.000000e+00> : vector<16xf32>
      %24 = vector.multi_reduction <add>, %23, %cst_16 [1] : vector<16x32xf32> to vector<16xf32>
      %25 = vector.shape_cast %24 : vector<16xf32> to vector<16x1xf32>
      %cst_17 = arith.constant 3.200000e+01 : f32
      %26 = vector.broadcast %cst_17 : f32 to vector<16x1xf32>
      %27 = arith.divf %25, %26 : vector<16x1xf32>
      %28 = vector.broadcast %18 : vector<16x1xf32> to vector<16x32xf32>
      %29 = arith.subf %12, %28 : vector<16x32xf32>
      %cst_18 = arith.constant 9.99999974E-6 : f32
      %30 = vector.broadcast %cst_18 : f32 to vector<16x1xf32>
      %31 = arith.addf %27, %30 : vector<16x1xf32>
      %32 = math.rsqrt %31 : vector<16x1xf32>
      %33 = vector.broadcast %32 : vector<16x1xf32> to vector<16x32xf32>
      %34 = arith.mulf %29, %33 : vector<16x32xf32>
      %35 = vector.broadcast %13 : vector<1x32xf32> to vector<16x32xf32>
      %36 = arith.mulf %34, %35 : vector<16x32xf32>
      %37 = vector.broadcast %14 : vector<1x32xf32> to vector<16x32xf32>
      %38 = arith.addf %36, %37 : vector<16x32xf32>
      %39 = arith.truncf %38 : vector<16x32xf32> to vector<16x32xbf16>
      %c0_19 = arith.constant 0 : index
      %c0_20 = arith.constant 0 : index
      %40 = vector.load %arg7[%c0_19, %c0_20] : memref<16x32xbf16, #tpu.memory_space<vmem>>, vector<16x32xbf16>
      tpu.vector_store %arg7[%c0_19, %c0_20], %39 {strides = array<i32>} : memref<16x32xbf16, #tpu.memory_space<vmem>>, vector<16x32xbf16>,
    } else {
    }
    %c0 = arith.constant 0 : index
    %c0_1 = arith.constant 0 : index
    %3 = vector.load %arg7[%c0, %c0_1] : memref<16x32xbf16, #tpu.memory_space<vmem>>, vector<16x32xbf16>
    %c0_2 = arith.constant 0 : index
    %c0_3 = arith.constant 0 : index
    %4 = vector.load %arg4[%c0_2, %c0_3] : memref<32x96xbf16, #tpu.memory_space<vmem>>, vector<32x96xbf16>
    %cst = arith.constant dense<0.000000e+00> : vector<16x96xf32>
    %5 = tpu.matmul %3, %4, %cst {dimension_numbers = #tpu.dot_dimension_numbers<[1], [0], [0], [1], [0, 0, 1, 1], [], []>} : vector<16x32xbf16>, vector<32x96xbf16>, vector<16x96xf32> -> vector<16x96xf32>
    %c0_4 = arith.constant 0 : index
    %c0_5 = arith.constant 0 : index
    %6 = vector.load %arg5[%c0_4, %c0_5] : memref<1x96xf32, #tpu.memory_space<vmem>>, vector<1x96xf32>
    %7 = vector.broadcast %6 : vector<1x96xf32> to vector<16x96xf32>
    %8 = arith.addf %5, %7 : vector<16x96xf32>
    %9 = arith.truncf %8 : vector<16x96xf32> to vector<16x96xbf16>
    %c0_6 = arith.constant 0 : index
    %c0_7 = arith.constant 0 : index
    %10 = vector.load %arg6[%c0_6, %c0_7] : memref<16x96xbf16, #tpu.memory_space<vmem>>, vector<16x96xbf16>
    tpu.vector_store %arg6[%c0_6, %c0_7], %9 {strides = array<i32>} : memref<16x96xbf16, #tpu.memory_space<vmem>>, vector<16x96xbf16>,
    return
  }
  func.func @transform_0(%arg0: i32) -> (i32, i32) {
    %c0_i32 = arith.constant 0 : i32
    %c0_i32_0 = arith.constant 0 : i32
    %c0_i32_1 = arith.constant 0 : i32
    return %c0_i32, %c0_i32_0 : i32, i32
  }
  func.func @transform_1(%arg0: i32) -> (i32, i32) {
    %c0_i32 = arith.constant 0 : i32
    %c0_i32_0 = arith.constant 0 : i32
    %c0_i32_1 = arith.constant 0 : i32
    return %c0_i32, %c0_i32_0 : i32, i32
  }
  func.func @transform_2(%arg0: i32) -> (i32, i32) {
    %c0_i32 = arith.constant 0 : i32
    %c0_i32_0 = arith.constant 0 : i32
    %c0_i32_1 = arith.constant 0 : i32
    return %c0_i32, %c0_i32_0 : i32, i32
  }
  func.func @transform_3(%arg0: i32) -> (i32, i32) {
    %c0_i32 = arith.constant 0 : i32
    %c0_i32_0 = arith.constant 0 : i32
    return %c0_i32, %arg0 : i32, i32
  }
  func.func @transform_4(%arg0: i32) -> (i32, i32) {
    %c0_i32 = arith.constant 0 : i32
    %c0_i32_0 = arith.constant 0 : i32
    return %c0_i32, %arg0 : i32, i32
  }
  func.func @transform_5(%arg0: i32) -> (i32, i32) {
    %c0_i32 = arith.constant 0 : i32
    %c0_i32_0 = arith.constant 0 : i32
    return %c0_i32, %arg0 : i32, i32
  }
}

module attributes {stable_mosaic.version = 11 : i64} {
  func.func @_causal_mha_kernel(%arg0: i32, %arg1: i32, %arg2: memref<1x8x96xbf16, #tpu.memory_space<vmem>>, %arg3: memref<1x8x32xbf16, #tpu.memory_space<vmem>>) attributes {dimension_semantics = [#tpu.dimension_semantics<parallel>, #tpu.dimension_semantics<parallel>], iteration_bounds = array<i64: 2, 1>, scalar_prefetch = 0 : i64, scratch_operands = 0 : i64, tpu.core_type = #tpu.core_type<tc>, window_params = [{transform_indices = @transform_0, window_bounds = array<i64: 1, 8, 96>}, {transform_indices = @transform_1, window_bounds = array<i64: 1, 8, 32>}]} {
    %c0 = arith.constant 0 : index
    %c0_0 = arith.constant 0 : index
    %c0_1 = arith.constant 0 : index
    %0 = vector.load %arg2[%c0, %c0_0, %c0_1] : memref<1x8x96xbf16, #tpu.memory_space<vmem>>, vector<1x8x96xbf16>
    %1 = vector.shape_cast %0 : vector<1x8x96xbf16> to vector<8x96xbf16>
    %2 = tpu.iota {dimensions = array<i32: 0>} : vector<8x8xi32>
    %3 = tpu.iota {dimensions = array<i32: 1>} : vector<8x8xi32>
    %4 = arith.cmpi sle, %3, %2 : vector<8x8xi32>
    %5 = vector.extract_strided_slice %1 {offsets = [0, 0], sizes = [8, 8], strides = [1, 1]} : vector<8x96xbf16> to vector<8x8xbf16>
    %6 = vector.extract_strided_slice %1 {offsets = [0, 32], sizes = [8, 8], strides = [1, 1]} : vector<8x96xbf16> to vector<8x8xbf16>
    %7 = vector.extract_strided_slice %1 {offsets = [0, 64], sizes = [8, 8], strides = [1, 1]} : vector<8x96xbf16> to vector<8x8xbf16>
    %cst = arith.constant dense<0.000000e+00> : vector<8x8xf32>
    %8 = tpu.matmul %5, %6, %cst {dimension_numbers = #tpu.dot_dimension_numbers<[1], [1], [0], [0], [0, 0, 1, 0], [], []>} : vector<8x8xbf16>, vector<8x8xbf16>, vector<8x8xf32> -> vector<8x8xf32>
    %cst_2 = arith.constant -1.000000e+09 : f32
    %9 = vector.broadcast %cst_2 : f32 to vector<8x8xf32>
    %10 = arith.select %4, %8, %9 : vector<8x8xi1>, vector<8x8xf32>
    %cst_3 = arith.constant dense<0xFF800000> : vector<8xf32>
    %11 = vector.multi_reduction <maximumf>, %10, %cst_3 [1] : vector<8x8xf32> to vector<8xf32>
    %12 = vector.shape_cast %11 : vector<8xf32> to vector<8x1xf32>
    %13 = vector.broadcast %12 : vector<8x1xf32> to vector<8x8xf32>
    %14 = arith.subf %10, %13 : vector<8x8xf32>
    %15 = math.exp %14 : vector<8x8xf32>
    %cst_4 = arith.constant dense<0.000000e+00> : vector<8xf32>
    %16 = vector.multi_reduction <add>, %15, %cst_4 [1] : vector<8x8xf32> to vector<8xf32>
    %17 = vector.shape_cast %16 : vector<8xf32> to vector<8x1xf32>
    %18 = vector.broadcast %17 : vector<8x1xf32> to vector<8x8xf32>
    %19 = arith.divf %15, %18 : vector<8x8xf32>
    %20 = arith.truncf %19 : vector<8x8xf32> to vector<8x8xbf16>
    %cst_5 = arith.constant dense<0.000000e+00> : vector<8x8xf32>
    %21 = tpu.matmul %20, %7, %cst_5 {dimension_numbers = #tpu.dot_dimension_numbers<[1], [0], [0], [1], [0, 0, 1, 1], [], []>} : vector<8x8xbf16>, vector<8x8xbf16>, vector<8x8xf32> -> vector<8x8xf32>
    %22 = vector.extract_strided_slice %1 {offsets = [0, 8], sizes = [8, 8], strides = [1, 1]} : vector<8x96xbf16> to vector<8x8xbf16>
    %23 = vector.extract_strided_slice %1 {offsets = [0, 40], sizes = [8, 8], strides = [1, 1]} : vector<8x96xbf16> to vector<8x8xbf16>
    %24 = vector.extract_strided_slice %1 {offsets = [0, 72], sizes = [8, 8], strides = [1, 1]} : vector<8x96xbf16> to vector<8x8xbf16>
    %cst_6 = arith.constant dense<0.000000e+00> : vector<8x8xf32>
    %25 = tpu.matmul %22, %23, %cst_6 {dimension_numbers = #tpu.dot_dimension_numbers<[1], [1], [0], [0], [0, 0, 1, 0], [], []>} : vector<8x8xbf16>, vector<8x8xbf16>, vector<8x8xf32> -> vector<8x8xf32>
    %cst_7 = arith.constant -1.000000e+09 : f32
    %26 = vector.broadcast %cst_7 : f32 to vector<8x8xf32>
    %27 = arith.select %4, %25, %26 : vector<8x8xi1>, vector<8x8xf32>
    %cst_8 = arith.constant dense<0xFF800000> : vector<8xf32>
    %28 = vector.multi_reduction <maximumf>, %27, %cst_8 [1] : vector<8x8xf32> to vector<8xf32>
    %29 = vector.shape_cast %28 : vector<8xf32> to vector<8x1xf32>
    %30 = vector.broadcast %29 : vector<8x1xf32> to vector<8x8xf32>
    %31 = arith.subf %27, %30 : vector<8x8xf32>
    %32 = math.exp %31 : vector<8x8xf32>
    %cst_9 = arith.constant dense<0.000000e+00> : vector<8xf32>
    %33 = vector.multi_reduction <add>, %32, %cst_9 [1] : vector<8x8xf32> to vector<8xf32>
    %34 = vector.shape_cast %33 : vector<8xf32> to vector<8x1xf32>
    %35 = vector.broadcast %34 : vector<8x1xf32> to vector<8x8xf32>
    %36 = arith.divf %32, %35 : vector<8x8xf32>
    %37 = arith.truncf %36 : vector<8x8xf32> to vector<8x8xbf16>
    %cst_10 = arith.constant dense<0.000000e+00> : vector<8x8xf32>
    %38 = tpu.matmul %37, %24, %cst_10 {dimension_numbers = #tpu.dot_dimension_numbers<[1], [0], [0], [1], [0, 0, 1, 1], [], []>} : vector<8x8xbf16>, vector<8x8xbf16>, vector<8x8xf32> -> vector<8x8xf32>
    %39 = vector.extract_strided_slice %1 {offsets = [0, 16], sizes = [8, 8], strides = [1, 1]} : vector<8x96xbf16> to vector<8x8xbf16>
    %40 = vector.extract_strided_slice %1 {offsets = [0, 48], sizes = [8, 8], strides = [1, 1]} : vector<8x96xbf16> to vector<8x8xbf16>
    %41 = vector.extract_strided_slice %1 {offsets = [0, 80], sizes = [8, 8], strides = [1, 1]} : vector<8x96xbf16> to vector<8x8xbf16>
    %cst_11 = arith.constant dense<0.000000e+00> : vector<8x8xf32>
    %42 = tpu.matmul %39, %40, %cst_11 {dimension_numbers = #tpu.dot_dimension_numbers<[1], [1], [0], [0], [0, 0, 1, 0], [], []>} : vector<8x8xbf16>, vector<8x8xbf16>, vector<8x8xf32> -> vector<8x8xf32>
    %cst_12 = arith.constant -1.000000e+09 : f32
    %43 = vector.broadcast %cst_12 : f32 to vector<8x8xf32>
    %44 = arith.select %4, %42, %43 : vector<8x8xi1>, vector<8x8xf32>
    %cst_13 = arith.constant dense<0xFF800000> : vector<8xf32>
    %45 = vector.multi_reduction <maximumf>, %44, %cst_13 [1] : vector<8x8xf32> to vector<8xf32>
    %46 = vector.shape_cast %45 : vector<8xf32> to vector<8x1xf32>
    %47 = vector.broadcast %46 : vector<8x1xf32> to vector<8x8xf32>
    %48 = arith.subf %44, %47 : vector<8x8xf32>
    %49 = math.exp %48 : vector<8x8xf32>
    %cst_14 = arith.constant dense<0.000000e+00> : vector<8xf32>
    %50 = vector.multi_reduction <add>, %49, %cst_14 [1] : vector<8x8xf32> to vector<8xf32>
    %51 = vector.shape_cast %50 : vector<8xf32> to vector<8x1xf32>
    %52 = vector.broadcast %51 : vector<8x1xf32> to vector<8x8xf32>
    %53 = arith.divf %49, %52 : vector<8x8xf32>
    %54 = arith.truncf %53 : vector<8x8xf32> to vector<8x8xbf16>
    %cst_15 = arith.constant dense<0.000000e+00> : vector<8x8xf32>
    %55 = tpu.matmul %54, %41, %cst_15 {dimension_numbers = #tpu.dot_dimension_numbers<[1], [0], [0], [1], [0, 0, 1, 1], [], []>} : vector<8x8xbf16>, vector<8x8xbf16>, vector<8x8xf32> -> vector<8x8xf32>
    %56 = vector.extract_strided_slice %1 {offsets = [0, 24], sizes = [8, 8], strides = [1, 1]} : vector<8x96xbf16> to vector<8x8xbf16>
    %57 = vector.extract_strided_slice %1 {offsets = [0, 56], sizes = [8, 8], strides = [1, 1]} : vector<8x96xbf16> to vector<8x8xbf16>
    %58 = vector.extract_strided_slice %1 {offsets = [0, 88], sizes = [8, 8], strides = [1, 1]} : vector<8x96xbf16> to vector<8x8xbf16>
    %cst_16 = arith.constant dense<0.000000e+00> : vector<8x8xf32>
    %59 = tpu.matmul %56, %57, %cst_16 {dimension_numbers = #tpu.dot_dimension_numbers<[1], [1], [0], [0], [0, 0, 1, 0], [], []>} : vector<8x8xbf16>, vector<8x8xbf16>, vector<8x8xf32> -> vector<8x8xf32>
    %cst_17 = arith.constant -1.000000e+09 : f32
    %60 = vector.broadcast %cst_17 : f32 to vector<8x8xf32>
    %61 = arith.select %4, %59, %60 : vector<8x8xi1>, vector<8x8xf32>
    %cst_18 = arith.constant dense<0xFF800000> : vector<8xf32>
    %62 = vector.multi_reduction <maximumf>, %61, %cst_18 [1] : vector<8x8xf32> to vector<8xf32>
    %63 = vector.shape_cast %62 : vector<8xf32> to vector<8x1xf32>
    %64 = vector.broadcast %63 : vector<8x1xf32> to vector<8x8xf32>
    %65 = arith.subf %61, %64 : vector<8x8xf32>
    %66 = math.exp %65 : vector<8x8xf32>
    %cst_19 = arith.constant dense<0.000000e+00> : vector<8xf32>
    %67 = vector.multi_reduction <add>, %66, %cst_19 [1] : vector<8x8xf32> to vector<8xf32>
    %68 = vector.shape_cast %67 : vector<8xf32> to vector<8x1xf32>
    %69 = vector.broadcast %68 : vector<8x1xf32> to vector<8x8xf32>
    %70 = arith.divf %66, %69 : vector<8x8xf32>
    %71 = arith.truncf %70 : vector<8x8xf32> to vector<8x8xbf16>
    %cst_20 = arith.constant dense<0.000000e+00> : vector<8x8xf32>
    %72 = tpu.matmul %71, %58, %cst_20 {dimension_numbers = #tpu.dot_dimension_numbers<[1], [0], [0], [1], [0, 0, 1, 1], [], []>} : vector<8x8xbf16>, vector<8x8xbf16>, vector<8x8xf32> -> vector<8x8xf32>
    %73 = tpu.concatenate %21, %38, %55, %72 in 1 : vector<8x8xf32>, vector<8x8xf32>, vector<8x8xf32>, vector<8x8xf32> -> vector<8x32xf32>
    %74 = arith.truncf %73 : vector<8x32xf32> to vector<8x32xbf16>
    %c0_21 = arith.constant 0 : index
    %c0_22 = arith.constant 0 : index
    %c0_23 = arith.constant 0 : index
    %75 = vector.load %arg3[%c0_21, %c0_22, %c0_23] : memref<1x8x32xbf16, #tpu.memory_space<vmem>>, vector<1x8x32xbf16>
    %76 = vector.shape_cast %75 : vector<1x8x32xbf16> to vector<8x32xbf16>
    %77 = vector.shape_cast %74 : vector<8x32xbf16> to vector<1x8x32xbf16>
    tpu.vector_store %arg3[%c0_21, %c0_22, %c0_23], %77 {strides = array<i32>} : memref<1x8x32xbf16, #tpu.memory_space<vmem>>, vector<1x8x32xbf16>,
    return
  }
  func.func @transform_0(%arg0: i32, %arg1: i32) -> (i32, i32, i32) {
    %c0_i32 = arith.constant 0 : i32
    %c0_i32_0 = arith.constant 0 : i32
    return %arg0, %c0_i32, %arg1 : i32, i32, i32
  }
  func.func @transform_1(%arg0: i32, %arg1: i32) -> (i32, i32, i32) {
    %c0_i32 = arith.constant 0 : i32
    %c0_i32_0 = arith.constant 0 : i32
    return %arg0, %c0_i32, %arg1 : i32, i32, i32
  }
}

module attributes {stable_mosaic.version = 11 : i64} {
  func.func @_mlp_block_kernel(%arg0: i32, %arg1: memref<16x32xbf16, #tpu.memory_space<vmem>>, %arg2: memref<1x32xf32, #tpu.memory_space<vmem>>, %arg3: memref<1x32xf32, #tpu.memory_space<vmem>>, %arg4: memref<32x128xbf16, #tpu.memory_space<vmem>>, %arg5: memref<1x128xf32, #tpu.memory_space<vmem>>, %arg6: memref<128x32xbf16, #tpu.memory_space<vmem>>, %arg7: memref<1x32xf32, #tpu.memory_space<vmem>>, %arg8: memref<16x32xbf16, #tpu.memory_space<vmem>>, %arg9: memref<16x32xbf16, #tpu.memory_space<vmem>>, %arg10: memref<16x32xf32, #tpu.memory_space<vmem>>) attributes {dimension_semantics = [#tpu.dimension_semantics<arbitrary>], iteration_bounds = array<i64: 1>, scalar_prefetch = 0 : i64, scratch_operands = 2 : i64, tpu.core_type = #tpu.core_type<tc>, window_params = [{pipeline_mode = #tpu.pipeline_mode<synchronous>, transform_indices = @transform_0, window_bounds = array<i64: 16, 32>}, {pipeline_mode = #tpu.pipeline_mode<synchronous>, transform_indices = @transform_1, window_bounds = array<i64: 1, 32>}, {pipeline_mode = #tpu.pipeline_mode<synchronous>, transform_indices = @transform_2, window_bounds = array<i64: 1, 32>}, {transform_indices = @transform_3, window_bounds = array<i64: 32, 128>}, {transform_indices = @transform_4, window_bounds = array<i64: 1, 128>}, {transform_indices = @transform_5, window_bounds = array<i64: 128, 32>}, {pipeline_mode = #tpu.pipeline_mode<synchronous>, transform_indices = @transform_6, window_bounds = array<i64: 1, 32>}, {pipeline_mode = #tpu.pipeline_mode<synchronous>, transform_indices = @transform_7, window_bounds = array<i64: 16, 32>}]} {
    %c0_i32 = arith.constant 0 : i32
    %0 = arith.cmpi eq, %arg0, %c0_i32 : i32
    %1 = arith.extui %0 : i1 to i32
    %c0_i32_0 = arith.constant 0 : i32
    %2 = arith.cmpi ne, %1, %c0_i32_0 : i32
    scf.if %2 {
      %c0_17 = arith.constant 0 : index
      %c0_18 = arith.constant 0 : index
      %26 = vector.load %arg1[%c0_17, %c0_18] : memref<16x32xbf16, #tpu.memory_space<vmem>>, vector<16x32xbf16>
      %27 = arith.extf %26 : vector<16x32xbf16> to vector<16x32xf32>
      %c0_19 = arith.constant 0 : index
      %c0_20 = arith.constant 0 : index
      %28 = vector.load %arg2[%c0_19, %c0_20] : memref<1x32xf32, #tpu.memory_space<vmem>>, vector<1x32xf32>
      %c0_21 = arith.constant 0 : index
      %c0_22 = arith.constant 0 : index
      %29 = vector.load %arg3[%c0_21, %c0_22] : memref<1x32xf32, #tpu.memory_space<vmem>>, vector<1x32xf32>
      %cst_23 = arith.constant dense<0.000000e+00> : vector<16xf32>
      %30 = vector.multi_reduction <add>, %27, %cst_23 [1] : vector<16x32xf32> to vector<16xf32>
      %31 = vector.shape_cast %30 : vector<16xf32> to vector<16x1xf32>
      %cst_24 = arith.constant 3.200000e+01 : f32
      %32 = vector.broadcast %cst_24 : f32 to vector<16x1xf32>
      %33 = arith.divf %31, %32 : vector<16x1xf32>
      %34 = vector.broadcast %33 : vector<16x1xf32> to vector<16x32xf32>
      %35 = arith.subf %27, %34 : vector<16x32xf32>
      %36 = vector.broadcast %33 : vector<16x1xf32> to vector<16x32xf32>
      %37 = arith.subf %27, %36 : vector<16x32xf32>
      %38 = arith.mulf %35, %37 : vector<16x32xf32>
      %cst_25 = arith.constant dense<0.000000e+00> : vector<16xf32>
      %39 = vector.multi_reduction <add>, %38, %cst_25 [1] : vector<16x32xf32> to vector<16xf32>
      %40 = vector.shape_cast %39 : vector<16xf32> to vector<16x1xf32>
      %cst_26 = arith.constant 3.200000e+01 : f32
      %41 = vector.broadcast %cst_26 : f32 to vector<16x1xf32>
      %42 = arith.divf %40, %41 : vector<16x1xf32>
      %43 = vector.broadcast %33 : vector<16x1xf32> to vector<16x32xf32>
      %44 = arith.subf %27, %43 : vector<16x32xf32>
      %cst_27 = arith.constant 9.99999974E-6 : f32
      %45 = vector.broadcast %cst_27 : f32 to vector<16x1xf32>
      %46 = arith.addf %42, %45 : vector<16x1xf32>
      %47 = math.rsqrt %46 : vector<16x1xf32>
      %48 = vector.broadcast %47 : vector<16x1xf32> to vector<16x32xf32>
      %49 = arith.mulf %44, %48 : vector<16x32xf32>
      %50 = vector.broadcast %28 : vector<1x32xf32> to vector<16x32xf32>
      %51 = arith.mulf %49, %50 : vector<16x32xf32>
      %52 = vector.broadcast %29 : vector<1x32xf32> to vector<16x32xf32>
      %53 = arith.addf %51, %52 : vector<16x32xf32>
      %54 = arith.truncf %53 : vector<16x32xf32> to vector<16x32xbf16>
      %c0_28 = arith.constant 0 : index
      %c0_29 = arith.constant 0 : index
      %55 = vector.load %arg9[%c0_28, %c0_29] : memref<16x32xbf16, #tpu.memory_space<vmem>>, vector<16x32xbf16>
      tpu.vector_store %arg9[%c0_28, %c0_29], %54 {strides = array<i32>} : memref<16x32xbf16, #tpu.memory_space<vmem>>, vector<16x32xbf16>,
      %c0_30 = arith.constant 0 : index
      %c0_31 = arith.constant 0 : index
      %56 = vector.load %arg7[%c0_30, %c0_31] : memref<1x32xf32, #tpu.memory_space<vmem>>, vector<1x32xf32>
      %57 = vector.broadcast %56 : vector<1x32xf32> to vector<16x32xf32>
      %58 = arith.addf %27, %57 : vector<16x32xf32>
      %c0_32 = arith.constant 0 : index
      %c0_33 = arith.constant 0 : index
      %59 = vector.load %arg10[%c0_32, %c0_33] : memref<16x32xf32, #tpu.memory_space<vmem>>, vector<16x32xf32>
      tpu.vector_store %arg10[%c0_32, %c0_33], %58 {strides = array<i32>} : memref<16x32xf32, #tpu.memory_space<vmem>>, vector<16x32xf32>,
    } else {
    }
    %c0 = arith.constant 0 : index
    %c0_1 = arith.constant 0 : index
    %3 = vector.load %arg9[%c0, %c0_1] : memref<16x32xbf16, #tpu.memory_space<vmem>>, vector<16x32xbf16>
    %c0_2 = arith.constant 0 : index
    %c0_3 = arith.constant 0 : index
    %4 = vector.load %arg4[%c0_2, %c0_3] : memref<32x128xbf16, #tpu.memory_space<vmem>>, vector<32x128xbf16>
    %cst = arith.constant dense<0.000000e+00> : vector<16x128xf32>
    %5 = tpu.matmul %3, %4, %cst {dimension_numbers = #tpu.dot_dimension_numbers<[1], [0], [0], [1], [0, 0, 1, 1], [], []>} : vector<16x32xbf16>, vector<32x128xbf16>, vector<16x128xf32> -> vector<16x128xf32>
    %c0_4 = arith.constant 0 : index
    %c0_5 = arith.constant 0 : index
    %6 = vector.load %arg5[%c0_4, %c0_5] : memref<1x128xf32, #tpu.memory_space<vmem>>, vector<1x128xf32>
    %7 = vector.broadcast %6 : vector<1x128xf32> to vector<16x128xf32>
    %8 = arith.addf %5, %7 : vector<16x128xf32>
    %cst_6 = arith.constant 1.702000e+00 : f32
    %9 = vector.broadcast %cst_6 : f32 to vector<16x128xf32>
    %10 = arith.mulf %9, %8 : vector<16x128xf32>
    %11 = arith.negf %10 : vector<16x128xf32>
    %12 = math.exp %11 : vector<16x128xf32>
    %cst_7 = arith.constant 1.000000e+00 : f32
    %13 = vector.broadcast %cst_7 : f32 to vector<16x128xf32>
    %14 = arith.addf %13, %12 : vector<16x128xf32>
    %15 = arith.divf %13, %14 : vector<16x128xf32>
    %16 = arith.mulf %8, %15 : vector<16x128xf32>
    %c0_8 = arith.constant 0 : index
    %c0_9 = arith.constant 0 : index
    %17 = vector.load %arg10[%c0_8, %c0_9] : memref<16x32xf32, #tpu.memory_space<vmem>>, vector<16x32xf32>
    %18 = arith.truncf %16 : vector<16x128xf32> to vector<16x128xbf16>
    %c0_10 = arith.constant 0 : index
    %c0_11 = arith.constant 0 : index
    %19 = vector.load %arg6[%c0_10, %c0_11] : memref<128x32xbf16, #tpu.memory_space<vmem>>, vector<128x32xbf16>
    %cst_12 = arith.constant dense<0.000000e+00> : vector<16x32xf32>
    %20 = tpu.matmul %18, %19, %cst_12 {dimension_numbers = #tpu.dot_dimension_numbers<[1], [0], [0], [1], [0, 0, 1, 1], [], []>} : vector<16x128xbf16>, vector<128x32xbf16>, vector<16x32xf32> -> vector<16x32xf32>
    %21 = arith.addf %17, %20 : vector<16x32xf32>
    %c0_13 = arith.constant 0 : index
    %c0_14 = arith.constant 0 : index
    %22 = vector.load %arg10[%c0_13, %c0_14] : memref<16x32xf32, #tpu.memory_space<vmem>>, vector<16x32xf32>
    tpu.vector_store %arg10[%c0_13, %c0_14], %21 {strides = array<i32>} : memref<16x32xf32, #tpu.memory_space<vmem>>, vector<16x32xf32>,
    %c0_i32_15 = arith.constant 0 : i32
    %23 = arith.cmpi eq, %arg0, %c0_i32_15 : i32
    %24 = arith.extui %23 : i1 to i32
    %c0_i32_16 = arith.constant 0 : i32
    %25 = arith.cmpi ne, %24, %c0_i32_16 : i32
    scf.if %25 {
      %c0_17 = arith.constant 0 : index
      %c0_18 = arith.constant 0 : index
      %26 = vector.load %arg10[%c0_17, %c0_18] : memref<16x32xf32, #tpu.memory_space<vmem>>, vector<16x32xf32>
      %27 = arith.truncf %26 : vector<16x32xf32> to vector<16x32xbf16>
      %c0_19 = arith.constant 0 : index
      %c0_20 = arith.constant 0 : index
      %28 = vector.load %arg8[%c0_19, %c0_20] : memref<16x32xbf16, #tpu.memory_space<vmem>>, vector<16x32xbf16>
      tpu.vector_store %arg8[%c0_19, %c0_20], %27 {strides = array<i32>} : memref<16x32xbf16, #tpu.memory_space<vmem>>, vector<16x32xbf16>,
    } else {
    }
    return
  }
  func.func @transform_0(%arg0: i32) -> (i32, i32) {
    %c0_i32 = arith.constant 0 : i32
    %c0_i32_0 = arith.constant 0 : i32
    %c0_i32_1 = arith.constant 0 : i32
    return %c0_i32, %c0_i32_0 : i32, i32
  }
  func.func @transform_1(%arg0: i32) -> (i32, i32) {
    %c0_i32 = arith.constant 0 : i32
    %c0_i32_0 = arith.constant 0 : i32
    %c0_i32_1 = arith.constant 0 : i32
    return %c0_i32, %c0_i32_0 : i32, i32
  }
  func.func @transform_2(%arg0: i32) -> (i32, i32) {
    %c0_i32 = arith.constant 0 : i32
    %c0_i32_0 = arith.constant 0 : i32
    %c0_i32_1 = arith.constant 0 : i32
    return %c0_i32, %c0_i32_0 : i32, i32
  }
  func.func @transform_3(%arg0: i32) -> (i32, i32) {
    %c0_i32 = arith.constant 0 : i32
    %c0_i32_0 = arith.constant 0 : i32
    return %c0_i32, %arg0 : i32, i32
  }
  func.func @transform_4(%arg0: i32) -> (i32, i32) {
    %c0_i32 = arith.constant 0 : i32
    %c0_i32_0 = arith.constant 0 : i32
    return %c0_i32, %arg0 : i32, i32
  }
  func.func @transform_5(%arg0: i32) -> (i32, i32) {
    %c0_i32 = arith.constant 0 : i32
    %c0_i32_0 = arith.constant 0 : i32
    return %arg0, %c0_i32 : i32, i32
  }
  func.func @transform_6(%arg0: i32) -> (i32, i32) {
    %c0_i32 = arith.constant 0 : i32
    %c0_i32_0 = arith.constant 0 : i32
    %c0_i32_1 = arith.constant 0 : i32
    return %c0_i32, %c0_i32_0 : i32, i32
  }
  func.func @transform_7(%arg0: i32) -> (i32, i32) {
    %c0_i32 = arith.constant 0 : i32
    %c0_i32_0 = arith.constant 0 : i32
    %c0_i32_1 = arith.constant 0 : i32
    return %c0_i32, %c0_i32_0 : i32, i32
  }
}

module attributes {stable_mosaic.version = 11 : i64} {
  func.func @_layernorm_kernel(%arg0: memref<16x32xbf16, #tpu.memory_space<vmem>>, %arg1: memref<1x32xf32, #tpu.memory_space<vmem>>, %arg2: memref<1x32xf32, #tpu.memory_space<vmem>>, %arg3: memref<16x32xf32, #tpu.memory_space<vmem>>) attributes {dimension_semantics = [], scalar_prefetch = 0 : i64, scratch_operands = 0 : i64, tpu.core_type = #tpu.core_type<tc>} {
    %c0 = arith.constant 0 : index
    %c0_0 = arith.constant 0 : index
    %0 = vector.load %arg0[%c0, %c0_0] : memref<16x32xbf16, #tpu.memory_space<vmem>>, vector<16x32xbf16>
    %1 = arith.extf %0 : vector<16x32xbf16> to vector<16x32xf32>
    %c0_1 = arith.constant 0 : index
    %c0_2 = arith.constant 0 : index
    %2 = vector.load %arg1[%c0_1, %c0_2] : memref<1x32xf32, #tpu.memory_space<vmem>>, vector<1x32xf32>
    %c0_3 = arith.constant 0 : index
    %c0_4 = arith.constant 0 : index
    %3 = vector.load %arg2[%c0_3, %c0_4] : memref<1x32xf32, #tpu.memory_space<vmem>>, vector<1x32xf32>
    %cst = arith.constant dense<0.000000e+00> : vector<16xf32>
    %4 = vector.multi_reduction <add>, %1, %cst [1] : vector<16x32xf32> to vector<16xf32>
    %5 = vector.shape_cast %4 : vector<16xf32> to vector<16x1xf32>
    %cst_5 = arith.constant 3.200000e+01 : f32
    %6 = vector.broadcast %cst_5 : f32 to vector<16x1xf32>
    %7 = arith.divf %5, %6 : vector<16x1xf32>
    %8 = vector.broadcast %7 : vector<16x1xf32> to vector<16x32xf32>
    %9 = arith.subf %1, %8 : vector<16x32xf32>
    %10 = vector.broadcast %7 : vector<16x1xf32> to vector<16x32xf32>
    %11 = arith.subf %1, %10 : vector<16x32xf32>
    %12 = arith.mulf %9, %11 : vector<16x32xf32>
    %cst_6 = arith.constant dense<0.000000e+00> : vector<16xf32>
    %13 = vector.multi_reduction <add>, %12, %cst_6 [1] : vector<16x32xf32> to vector<16xf32>
    %14 = vector.shape_cast %13 : vector<16xf32> to vector<16x1xf32>
    %cst_7 = arith.constant 3.200000e+01 : f32
    %15 = vector.broadcast %cst_7 : f32 to vector<16x1xf32>
    %16 = arith.divf %14, %15 : vector<16x1xf32>
    %17 = vector.broadcast %7 : vector<16x1xf32> to vector<16x32xf32>
    %18 = arith.subf %1, %17 : vector<16x32xf32>
    %cst_8 = arith.constant 9.99999974E-6 : f32
    %19 = vector.broadcast %cst_8 : f32 to vector<16x1xf32>
    %20 = arith.addf %16, %19 : vector<16x1xf32>
    %21 = math.rsqrt %20 : vector<16x1xf32>
    %22 = vector.broadcast %21 : vector<16x1xf32> to vector<16x32xf32>
    %23 = arith.mulf %18, %22 : vector<16x32xf32>
    %24 = vector.broadcast %2 : vector<1x32xf32> to vector<16x32xf32>
    %25 = arith.mulf %23, %24 : vector<16x32xf32>
    %26 = vector.broadcast %3 : vector<1x32xf32> to vector<16x32xf32>
    %27 = arith.addf %25, %26 : vector<16x32xf32>
    %c0_9 = arith.constant 0 : index
    %c0_10 = arith.constant 0 : index
    %28 = vector.load %arg3[%c0_9, %c0_10] : memref<16x32xf32, #tpu.memory_space<vmem>>, vector<16x32xf32>
    tpu.vector_store %arg3[%c0_9, %c0_10], %27 {strides = array<i32>} : memref<16x32xf32, #tpu.memory_space<vmem>>, vector<16x32xf32>,
    return
  }
}

</mosaic_0001>

<bundles_post_ra>
// kernel: clip_text_forward.9
= control target key start
LH: loop header
LB: loop body
LE: loop exit
PB: predicated region body
PF: predicated region fallthrough
CT: control target
= control target key end

     0   :  { %vm31_vm0 = vcmask 261120   ;;  %v194_v16 = vmov 0.0   ;;  %vm195_vm1 = vmmov 0   ;;  %vm154_vm2 = vcmask 781312   ;;  %s256_s0 = inlined_call_operand.vmem [shape: bf16[16,32], index: 0, kind: input, shape index: {}]   ;;  %s257_s3 = inlined_call_operand.vmem [shape: bf16[32,96], index: 3, kind: input, shape index: {}]   ;;  %s258_s1 = inlined_call_operand.vmem [shape: f32[1,32], index: 1, kind: input, shape index: {}]   ;;  %s259_s2 = inlined_call_operand.vmem [shape: f32[1,32], index: 2, kind: input, shape index: {}]   ;;  %s260_s4 = inlined_call_operand.vmem [shape: f32[1,96], index: 4, kind: input, shape index: {}]   ;;  %s261_s5 = inlined_call_operand.vmem [shape: bf16[16,96], index: 5, kind: output, shape index: {}]  }
   0x1   :  { %v172_v0 = vld [vmem:[%s256_s0] sm:$0xff]   ;;  %178 = vmatprep.subr.bf16.mxu0 %v194_v16  ;;  %v189_v17 = vld [vmem:[%s257_s3 + $0x8] sm:$0xff]   ;;  %182 = vmatprep.mubr.msk.bf16.mxu0 %vm195_vm1, %v194_v16 }
   0x2   :  { %v173_v1 = vunpack.c.l.bf16 %v172_v0  ;;  %v174_v2 = vunpack.c.h.bf16 %v172_v0  ;;  %v188_v15 = vld [vmem:[%s257_s3] sm:$0xff]  }
   0x3   :  { %179 = vmatpush3.bf16.msra.mxu0 %v188_v15  ;;  %v161_v26 = vld [vmem:[%s258_s1] ss:$0 sm:$0xff] }
   0x4   :  { %v32_v3 = vsel %vm31_vm0, %v173_v1, 0.0  ;;  %v35_v4 = vsel %vm31_vm0, %v174_v2, 0.0  ;;  %180 = vmatprep.subr.bf16.mxu0 %v194_v16  ;;  %v162_v30 = vld [vmem:[%s259_s2] ss:$0 sm:$0xff] }
   0x5   :  { %33 = vadd.xlane.f32.xlu0 %v32_v3  ;;  %v163_v36 = vld [vmem:[%s260_s4] ss:$0 sm:$0xff] }
   0x7   :  { %181 = vmatpush3.bf16.msra.mxu0 %v189_v17 }
   0x9   :  { %36 = vadd.xlane.f32.xlu0 %v35_v4 }
  0x92   :  { %v34_v5 = vpop.xlane.xlu0 %33 }
  0x93   :  { %v39_v6 = vmul.f32 0.03125, %v34_v5 }
  0x95   :  { %v41_v7 = vsub.f32 %v173_v1, %v39_v6 }
  0x96   :  { %v37_v8 = vpop.xlane.xlu0 %36 }
  0x97   :  { %v40_v9 = vmul.f32 0.03125, %v37_v8  ;;  %v43_v10 = vmul.f32 %v41_v7, %v41_v7 }
  0x99   :  { %v42_v11 = vsub.f32 %v174_v2, %v40_v9  ;;  %v45_v12 = vsel %vm31_vm0, %v43_v10, 0.0 }
  0x9a   :  { %46 = vadd.xlane.f32.xlu1 %v45_v12 }
  0x9b   :  { %v44_v13 = vmul.f32 %v42_v11, %v42_v11 }
  0x9d   :  { %v48_v14 = vsel %vm31_vm0, %v44_v13, 0.0 }
  0x9e   :  { %49 = vadd.xlane.f32.xlu1 %v48_v14 }
 0x127   :  { %v47_v18 = vpop.xlane.xlu1 %46 }
 0x128   :  { %v51_v19 = vmul.f32 0.03125, %v47_v18 }
 0x12a   :  { %v53_v20 = vadd.f32 1e-05, %v51_v19 }
 0x12b   :  { %v50_v21 = vpop.xlane.xlu1 %49 }
 0x12c   :  { %190 = vrsqrt.f32 %v53_v20  ;;  %v52_v22 = vmul.f32 0.03125, %v50_v21 }
 0x12e   :  { %v54_v23 = vadd.f32 1e-05, %v52_v22 }
 0x130   :  { %192 = vrsqrt.f32 %v54_v23 }
 0x136   :  { %v191_v24 = vpop.eup %190 }
 0x137   :  { %v57_v25 = vmul.f32 %v191_v24, %v41_v7 }
 0x139   :  { %v65_v28 = vmul.f32 %v161_v26, %v57_v25 }
 0x13a   :  { %v193_v27 = vpop.eup %192 }
 0x13b   :  { %v58_v29 = vmul.f32 %v193_v27, %v42_v11  ;;  %v73_v32 = vadd.f32 %v162_v30, %v65_v28 }
 0x13d   :  { %v66_v31 = vmul.f32 %v161_v26, %v58_v29 }
 0x13f   :  { %v74_v33 = vadd.f32 %v162_v30, %v66_v31 }
 0x141   :  { %v75_v34 = vpack.c.bf16 %v74_v33, %v73_v32 }
 0x143   :  { %76 = vst.msk [vmem:[#allocation2] sm:$0xff] %vm31_vm0, %v75_v34 }
 0x14a   :  { %v77_v35 = vld [vmem:[#allocation2] sm:$0xff] }
 0x14b   :  { %183 = vmatmul.mubr.msk.bf16.vlgmr.msra.gmra.mrb[0].mxu0 %vm31_vm0, %v77_v35 }
 0x21e   :  { %v139_v37 = vpop.f32.mrb[0].mxu0 }
 0x21f   :  { %v140_v38 = vadd.f32 %v163_v36, %v139_v37  ;;  %v184_v39 = vpop.f32.mrb[1].mxu0 }
 0x220   :  { %v142_v40 = vpop.f32.mrb[2].mxu0 }
 0x221   :  { %v169_v41 = vpack.c.bf16 %v140_v38, %v140_v38  ;;  %v143_v42 = vadd.f32 %v163_v36, %v142_v40  ;;  %v185_v43 = vpop.f32.mrb[3].mxu0 }
 0x223   :  { %155 = vst.msk [vmem:[%s261_s5] sm:$0xf] %vm154_vm2, %v169_v41  ;;  %v170_v44 = vpack.c.bf16 %v143_v42, %v143_v42 }
 0x225   :  { %156 = vst.msk [vmem:[%s261_s5 + $0x4] sm:$0xf] %vm154_vm2, %v170_v44 }

// kernel: clip_text_forward.11
= control target key start
LH: loop header
LB: loop body
LE: loop exit
PB: predicated region body
PF: predicated region fallthrough
CT: control target
= control target key end

     0   :  { %v143_v0 = vmov 0.0   ;;  %vm144_vm0 = vmmov 0   ;;  %vm48_vm1 = vcmask 261120   ;;  %vm107_vm2 = vcmask 257024   ;;  %s191_s1 = inlined_call_operand.vmem [shape: bf16[32,32], index: 1, kind: input, shape index: {}]   ;;  %s192_s0 = inlined_call_operand.vmem [shape: bf16[16,32], index: 0, kind: input, shape index: {}]   ;;  %s193_s3 = inlined_call_operand.vmem [shape: bf16[16,32], index: 3, kind: input, shape index: {}]   ;;  %s194_s2 = inlined_call_operand.vmem [shape: f32[1,32], index: 2, kind: input, shape index: {}]   ;;  %s195_s4 = inlined_call_operand.vmem [shape: bf16[16,32], index: 4, kind: output, shape index: {}]  }
   0x1   :  { %130 = vmatprep.subr.bf16.mxu0 %v143_v0  ;;  %v140_v1 = vld [vmem:[%s191_s1] sm:$0xff]   ;;  %134 = vmatprep.mubr.msk.bf16.mxu0 %vm144_vm0, %v143_v0  ;;  %v141_v2 = vld [vmem:[%s191_s1 + $0x8] sm:$0xff]  }
   0x2   :  { %131 = vmatpush3.bf16.msra.mxu0 %v140_v1  ;;  %v142_v3 = vld [vmem:[%s192_s0] sm:$0xff]  }
   0x3   :  { %132 = vmatprep.subr.bf16.mxu0 %v143_v0  ;;  %v124_v4 = vld [vmem:[%s193_s3] sm:$0xff]  }
   0x4   :  { %v114_v5 = vld [vmem:[%s194_s2] ss:$0 sm:$0xff]  ;;  %v125_v6 = vunpack.c.l.bf16 %v124_v4  ;;  %v126_v10 = vunpack.c.h.bf16 %v124_v4 }
   0x6   :  { %133 = vmatpush3.bf16.msra.mxu0 %v141_v2 }
   0x9   :  { %135 = vmatmul.mubr.msk.bf16.vlgmr.msra.gmra.mrb[0].mxu0 %vm48_vm1, %v142_v3 }
  0xdc   :  { %v86_v7 = vpop.f32.mrb[0].mxu0 }
  0xdd   :  { %v87_v8 = vadd.f32 %v114_v5, %v86_v7  ;;  %v136_v9 = vpop.f32.mrb[1].mxu0 }
  0xde   :  { %v89_v11 = vpop.f32.mrb[2].mxu0 }
  0xdf   :  { %v97_v12 = vadd.f32 %v125_v6, %v87_v8  ;;  %v90_v13 = vadd.f32 %v114_v5, %v89_v11  ;;  %v137_v14 = vpop.f32.mrb[3].mxu0 }
  0xe1   :  { %v121_v15 = vpack.c.bf16 %v97_v12, %v97_v12  ;;  %v98_v16 = vadd.f32 %v126_v10, %v90_v13 }
  0xe3   :  { %108 = vst.msk [vmem:[%s195_s4] sm:$0xf] %vm107_vm2, %v121_v15  ;;  %v122_v17 = vpack.c.bf16 %v98_v16, %v98_v16 }
  0xe5   :  { %109 = vst.msk [vmem:[%s195_s4 + $0x4] sm:$0xf] %vm107_vm2, %v122_v17 }

// kernel: clip_text_forward.10
= control target key start
LH: loop header
LB: loop body
LE: loop exit
PB: predicated region body
PF: predicated region fallthrough
CT: control target
= control target key end

     0   :  { %s880_s6 = smov 0   ;;  %s882_s7 = smov 0   ;;  %s1003_s0 = inlined_call_operand.vmem [shape: bf16[2,8,96], index: 0, kind: input, shape index: {}]   ;;  %s1004_s1 = inlined_call_operand.vmem [shape: bf16[2,8,32], index: 1, kind: output, shape index: {}]  }
   0x1   :  { %s884_s8 = smov 0  }
   0x2 LB: > { %s23_s9 = sadd.s32 1, %s848_s7  ;;  %p695_p0 = scmp.ge.s32.totalorder %s852_s8, 1  ;;  %s852_s8 = sphi %s884_s8, %s11_s8   ;;  %s848_s7 = sphi %s882_s7, %s1006_s7   ;;  %s844_s6 = sphi %s880_s6, %s1005_s6  }
   0x3   : > { %p25_p1 = scmp.ge.s32.totalorder %s23_s9, 2  ;;  %p105_p2 = scmp.lt.s32.totalorder %s852_s8, 3 }
   0x5   : > { %s1008_s9 = smov (%p25_p1, %s23_s9), 0  ;;  %p106_p3 = pnand %p695_p0, %p105_p2 }
   0x6   : > { %p129_p4 = scmp.lt.s32.totalorder (!%p106_p3), %s844_s6, 1  ;;  %v854_v0 = vmov (!%p106_p3), 0.0   ;;  %vm855_vm0 = vmmov (!%p106_p3), 0   ;;  %s856_s14 = smov (!%p106_p3), 96   ;;  %vm155_vm1 = vcmask (!%p106_p3), 64512   ;;  %v145_v5 = vlaneseq (!%p106_p3) }
   0x7   : > { %109 = sbr.rel (%p106_p3) target bundleno = 1601 (0x641), region = 24  ;;  %725 = vmatprep.subr.bf16.mxu0 (!%p106_p3), %v854_v0  ;;  %727 = vmatprep.mubr.msk.bf16.mxu0 (!%p106_p3), %vm855_vm0, %v854_v0  ;;  %s857_s15 = smov (!%p106_p3), 64   ;;  %vm220_vm3 = vcmask (!%p106_p3), 1043456   ;;  %vm610_vm4 = vcmask (!%p106_p3), 130048   ;;  %vm612_vm5 = vcmask (!%p106_p3), 195584   ;;  %vm615_vm6 = vcmask (!%p106_p3), 257024  }
   0x8   : > { %731 = vmatprep.subr.bf16.mxu1 (!%p106_p3), %v854_v0  ;;  %733 = vmatprep.mubr.msk.bf16.mxu1 (!%p106_p3), %vm855_vm0, %v854_v0  ;;  %s858_s16 = smov (!%p106_p3), 88   ;;  %v922_v6 = vshrl.u32 (!%p106_p3), %v145_v5, 7  ;;  %v924_v7 = vand.u32 (!%p106_p3), 127, %v145_v5  ;;  %s859_s17 = smov (!%p106_p3), 72  }
   0x9   : > { %s860_s18 = smov (!%p106_p3), 120   ;;  %s861_s19 = smov (!%p106_p3), 80  }
   0xa   : > { %vm149_vm2 = vcmp.le.s32.totalorder (!%p106_p3), %v924_v7, %v922_v6  ;;  %s862_s20 = smov (!%p106_p3), 112   ;;  %s863_s21 = smov (!%p106_p3), 104  }
   0xb   : > { %s864_s22 = smov (!%p106_p3), 56   ;;  %s865_s23 = smov (!%p106_p3), 48  }
   0xc   : > { %s866_s24 = smov (!%p106_p3), 40   ;;  %s867_s25 = smov (!%p106_p3), 8  }
   0xd   : > { %s868_s26 = smov (!%p106_p3), 16   ;;  %s869_s27 = smov (!%p106_p3), 24  }
   0xe   : > { %s1010_s6 = smov (!%p129_p4, %s844_s6), 1 }
   0xf   : > { %s696_s10 = sshll.u32 %s1010_s6, 2 }
  0x10   : > { %s135_s13 = scalar_lea.vmem %s1003_s0, %s696_s10  ;;  %s142_s30 = scalar_lea.vmem %s1004_s1, %s696_s10 }
  0x11   : > { %v144_v1 = vld [vmem:[%s135_s13] sm:$0xf] }
  0x12   : > { %v912_v2 = vcombine.low %v144_v1, %v144_v1 }
  0x14   : > { %153 = vrot.lane.b32.xlu0 %v912_v2, %s856_s14  ;;  %215 = vrot.lane.b32.xlu1 %v912_v2, %s857_s15 }
  0x18   : > { %266 = vrot.lane.b32.xlu1 %v912_v2, %s858_s16 }
  0x86   : > { %v154_v3 = vpop.permute.xlu0 %153  ;;  %v216_v14 = vpop.permute.xlu1 %215 }
  0x87   : > { %v160_v4 = vsel %vm155_vm1, %v154_v3, 0  ;;  %v222_v15 = vsel %vm220_vm3, %v216_v14, 0 }
  0x88   : > { %726 = vmatpush3.bf16.xpose.msra.mxu0 %v160_v4  ;;  %732 = vmatpush3.bf16.msra.mxu1 %v222_v15 }
  0x89   : > { %743 = vmatprep.subr.bf16.mxu0 %v854_v0  ;;  %737 = vmatprep.subr.bf16.mxu1 %v854_v0 }
  0x8a   : > { %v267_v21 = vpop.permute.xlu1 %266 }
  0x8b   : > { %v272_v27 = vsel %vm155_vm1, %v267_v21, 0 }
  0x8f   : > { %728 = vmatmul.mubr.msk.bf16.vlgmr.msra.gmra.mrb[0].mxu0 %vm155_vm1, %v144_v1 }
  0x90   : > { %745 = vmatprep.mubr.msk.bf16.mxu0 %vm855_vm0, %v854_v0 }
 0x162   : > { %v196_v8 = vpop.f32.mrb[0].mxu0 }
 0x163   : > { %v202_v9 = vsel %vm149_vm2, %v196_v8, -1e+09  ;;  %v729_v10 = vpop.f32.mrb[1].mxu0 }
 0x164   : > { %v199_v11 = vpop.f32.mrb[2].mxu0  ;;  %v203_v12 = vsel %vm155_vm1, %v202_v9, -inf }
 0x165   : > { %204 = vmax.xlane.f32.xlu0 %v203_v12  ;;  %v730_v13 = vpop.f32.mrb[3].mxu0 }
 0x17b   : > { %488 = vrot.lane.b32.xlu0 %v912_v2, %s859_s17 }
 0x1f2   : > { %v205_v16 = vpop.xlane.xlu0 %204 }
 0x1f3   : > { %v206_v17 = vsub.f32 %v202_v9, %v205_v16 }
 0x1f5   : > { %v207_v18 = vmul.f32 1.442695, %v206_v17 }
 0x1f6   : > { %v489_v30 = vpop.permute.xlu0 %488 }
 0x1f7   : > { %814 = vpow2.f32 %v207_v18  ;;  %v494_v32 = vsel %vm155_vm1, %v489_v30, 0 }
 0x201   : > { %v815_v19 = vpop.eup %814 }
 0x202   : > { %v209_v20 = vsel %vm155_vm1, %v815_v19, 0.0 }
 0x203   : > { %210 = vadd.xlane.f32.xlu1 %v209_v20 }
 0x214   : > { %264 = vrot.lane.b32.xlu1 %v912_v2, %s860_s18 }
 0x218   : > { %377 = vrot.lane.b32.xlu1 %v912_v2, %s861_s19 }
 0x21c   : > { %375 = vrot.lane.b32.xlu1 %v912_v2, %s862_s20 }
 0x220   : > { %486 = vrot.lane.b32.xlu1 %v912_v2, %s863_s21 }
 0x290   : > { %v211_v22 = vpop.xlane.xlu1 %210 }
 0x291   : > { %816 = vrcp.f32 %v211_v22 }
 0x294   : > { %v265_v25 = vpop.permute.xlu1 %264 }
 0x298   : > { %v378_v28 = vpop.permute.xlu1 %377 }
 0x299   : > { %v383_v29 = vsel %vm155_vm1, %v378_v28, 0 }
 0x29b   : > { %v817_v23 = vpop.eup %816 }
 0x29c   : > { %v213_v24 = vmul.f32 %v817_v23, %v815_v19  ;;  %v376_v31 = vpop.permute.xlu1 %375 }
 0x29e   : > { %v214_v26 = vpack.c.bf16 %v213_v24, %v213_v24 }
 0x2a0   : > { %734 = vmatmul.mubr.msk.bf16.vlgmr.msra.gmra.mrb[0].mxu1 %vm155_vm1, %v214_v26  ;;  %v487_v33 = vpop.permute.xlu1 %486 }
 0x2a1   : > { %738 = vmatpush3.bf16.xpose.msra.mxu1 %v272_v27  ;;  %739 = vmatprep.mubr.msk.bf16.mxu1 %vm855_vm0, %v854_v0 }
 0x2a2   : > { %749 = vmatprep.subr.bf16.mxu1 %v854_v0 }
 0x2a8   : > { %740 = vmatmul.mubr.msk.bf16.vlgmr.msra.gmra.mrb[4].mxu1 %vm155_vm1, %v265_v25 }
 0x2a9   : > { %750 = vmatpush3.bf16.xpose.msra.mxu1 %v383_v29  ;;  %751 = vmatprep.mubr.msk.bf16.mxu1 %vm855_vm0, %v854_v0 }
 0x2aa   : > { %761 = vmatprep.subr.bf16.mxu1 %v854_v0 }
 0x2b0   : > { %752 = vmatmul.mubr.msk.bf16.vlgmr.msra.gmra.mrb[8].mxu1 %vm155_vm1, %v376_v31 }
 0x2b1   : > { %762 = vmatpush3.bf16.xpose.msra.mxu1 %v494_v32  ;;  %763 = vmatprep.mubr.msk.bf16.mxu1 %vm855_vm0, %v854_v0 }
 0x2b8   : > { %764 = vmatmul.mubr.msk.bf16.vlgmr.msra.gmra.mrb[12].mxu1 %vm155_vm1, %v487_v33 }
 0x373   : > { %v955_v34 = vpop.f32.mrb[0].mxu1 }
 0x374   : > { %v735_v35 = vpop.f32.mrb[1].mxu1 }
 0x375   : > { %v261_v36 = vpop.f32.mrb[2].mxu1 }
 0x376   : > { %v736_v37 = vpop.f32.mrb[3].mxu1 }
 0x37b   : > { %v308_v38 = vpop.f32.mrb[4].mxu1 }
 0x37c   : > { %v314_v39 = vsel %vm149_vm2, %v308_v38, -1e+09  ;;  %v741_v40 = vpop.f32.mrb[5].mxu1 }
 0x37d   : > { %v311_v41 = vpop.f32.mrb[6].mxu1  ;;  %v315_v42 = vsel %vm155_vm1, %v314_v39, -inf }
 0x37e   : > { %316 = vmax.xlane.f32.xlu1 %v315_v42  ;;  %v742_v43 = vpop.f32.mrb[7].mxu1 }
 0x383   : > { %v419_v44 = vpop.f32.mrb[8].mxu1 }
 0x384   : > { %v425_v45 = vsel %vm149_vm2, %v419_v44, -1e+09  ;;  %v753_v46 = vpop.f32.mrb[9].mxu1 }
 0x385   : > { %v426_v47 = vsel %vm155_vm1, %v425_v45, -inf  ;;  %v422_v48 = vpop.f32.mrb[10].mxu1 }
 0x386   : > { %427 = vmax.xlane.f32.xlu0 %v426_v47  ;;  %v754_v49 = vpop.f32.mrb[11].mxu1 }
 0x38b   : > { %v530_v50 = vpop.f32.mrb[12].mxu1 }
 0x38c   : > { %v536_v51 = vsel %vm149_vm2, %v530_v50, -1e+09  ;;  %v765_v52 = vpop.f32.mrb[13].mxu1 }
 0x38d   : > { %v537_v53 = vsel %vm155_vm1, %v536_v51, -inf  ;;  %v533_v54 = vpop.f32.mrb[14].mxu1 }
 0x38e   : > { %538 = vmax.xlane.f32.xlu1 %v537_v53  ;;  %v766_v55 = vpop.f32.mrb[15].mxu1 }
 0x40b   : > { %v317_v56 = vpop.xlane.xlu1 %316 }
 0x40c   : > { %v318_v57 = vsub.f32 %v314_v39, %v317_v56 }
 0x40e   : > { %v319_v58 = vmul.f32 1.442695, %v318_v57 }
 0x410   : > { %818 = vpow2.f32 %v319_v58 }
 0x413   : > { %v428_v4 = vpop.xlane.xlu0 %427 }
 0x414   : > { %v429_v5 = vsub.f32 %v425_v45, %v428_v4 }
 0x416   : > { %v430_v6 = vmul.f32 1.442695, %v429_v5 }
 0x41a   : > { %v819_v59 = vpop.eup %818 }
 0x41b   : > { %v539_v60 = vpop.xlane.xlu1 %538  ;;  %v321_v61 = vsel %vm155_vm1, %v819_v59, 0.0 }
 0x41c   : > { %v540_v62 = vsub.f32 %v536_v51, %v539_v60  ;;  %322 = vadd.xlane.f32.xlu1 %v321_v61 }
 0x41e   : > { %v541_v63 = vmul.f32 1.442695, %v540_v62 }
 0x420   : > { %820 = vpow2.f32 %v541_v63 }
 0x421   : > { %822 = vpow2.f32 %v430_v6 }
 0x42a   : > { %v821_v1 = vpop.eup %820 }
 0x42b   : > { %v543_v3 = vsel %vm155_vm1, %v821_v1, 0.0  ;;  %v823_v7 = vpop.eup %822 }
 0x42c   : > { %544 = vadd.xlane.f32.xlu0 %v543_v3  ;;  %v432_v8 = vsel %vm155_vm1, %v823_v7, 0.0 }
 0x42d   : > { %327 = vrot.lane.b32.xlu1 %v912_v2, %s864_s22 }
 0x442   : > { %438 = vrot.lane.b32.xlu0 %v912_v2, %s865_s23 }
 0x451   : > { %433 = vadd.xlane.f32.xlu1 %v432_v8 }
 0x462   : > { %549 = vrot.lane.b32.xlu1 %v912_v2, %s866_s24 }
 0x4a9   : > { %v323_v9 = vpop.xlane.xlu1 %322 }
 0x4aa   : > { %824 = vrcp.f32 %v323_v9 }
 0x4ad   : > { %v328_v10 = vpop.permute.xlu1 %327 }
 0x4ae   : > { %v333_v11 = vsel %vm220_vm3, %v328_v10, 0 }
 0x4af   : > { %744 = vmatpush3.bf16.msra.mxu0 %v333_v11 }
 0x4b0   : > { %755 = vmatprep.subr.bf16.mxu0 %v854_v0 }
 0x4b4   : > { %v825_v12 = vpop.eup %824 }
 0x4b5   : > { %v325_v13 = vmul.f32 %v825_v12, %v819_v59 }
 0x4b7   : > { %v326_v14 = vpack.c.bf16 %v325_v13, %v325_v13 }
 0x4b9   : > { %746 = vmatmul.mubr.msk.bf16.vlgmr.msra.gmra.mrb[4].mxu0 %vm155_vm1, %v326_v14  ;;  %v545_v15 = vpop.xlane.xlu0 %544 }
 0x4ba   : > { %757 = vmatprep.mubr.msk.bf16.mxu0 %vm855_vm0, %v854_v0 }
 0x4bd   : > { %v439_v16 = vpop.permute.xlu0 %438 }
 0x4be   : > { %v444_v2 = vsel %vm220_vm3, %v439_v16, 0 }
 0x4bf   : > { %756 = vmatpush3.bf16.msra.mxu0 %v444_v2 }
 0x4c0   : > { %767 = vmatprep.subr.bf16.mxu0 %v854_v0 }
 0x4de   : > { %v434_v17 = vpop.xlane.xlu1 %433 }
 0x4df   : > { %826 = vrcp.f32 %v434_v17 }
 0x4e0   : > { %828 = vrcp.f32 %v545_v15 }
 0x4e2   : > { %v550_v19 = vpop.permute.xlu1 %549 }
 0x4e3   : > { %v555_v21 = vsel %vm220_vm3, %v550_v19, 0 }
 0x4e9   : > { %v827_v18 = vpop.eup %826 }
 0x4ea   : > { %v436_v20 = vmul.f32 %v827_v18, %v823_v7  ;;  %v829_v23 = vpop.eup %828 }
 0x4eb   : > { %v547_v24 = vmul.f32 %v829_v23, %v821_v1 }
 0x4ec   : > { %v437_v22 = vpack.c.bf16 %v436_v20, %v436_v20 }
 0x4ed   : > { %v548_v25 = vpack.c.bf16 %v547_v24, %v547_v24 }
 0x4ee   : > { %758 = vmatmul.mubr.msk.bf16.vlgmr.msra.gmra.mrb[8].mxu0 %vm155_vm1, %v437_v22 }
 0x4ef   : > { %768 = vmatpush3.bf16.msra.mxu0 %v555_v21  ;;  %769 = vmatprep.mubr.msk.bf16.mxu0 %vm855_vm0, %v854_v0 }
 0x4f6   : > { %770 = vmatmul.mubr.msk.bf16.vlgmr.msra.gmra.mrb[12].mxu0 %vm155_vm1, %v548_v25 }
 0x58c   : > { %v369_v26 = vpop.f32.mrb[4].mxu0 }
 0x58d   : > { %598 = vrot.lane.b32.xlu1 %v369_v26, %s867_s25  ;;  %v747_v27 = vpop.f32.mrb[5].mxu0 }
 0x58e   : > { %v372_v28 = vpop.f32.mrb[6].mxu0 }
 0x58f   : > { %v748_v29 = vpop.f32.mrb[7].mxu0 }
 0x5c1   : > { %v480_v30 = vpop.f32.mrb[8].mxu0 }
 0x5c2   : > { %602 = vrot.lane.b32.xlu0 %v480_v30, %s868_s26  ;;  %v759_v31 = vpop.f32.mrb[9].mxu0 }
 0x5c3   : > { %v483_v32 = vpop.f32.mrb[10].mxu0 }
 0x5c4   : > { %v760_v33 = vpop.f32.mrb[11].mxu0 }
 0x5c9   : > { %v591_v35 = vpop.f32.mrb[12].mxu0 }
 0x5ca   : > { %606 = vrot.lane.b32.xlu1 %v591_v35, %s869_s27  ;;  %v771_v0 = vpop.f32.mrb[13].mxu0 }
 0x5cb   : > { %v594_v36 = vpop.f32.mrb[14].mxu0 }
 0x5cc   : > { %v772_v37 = vpop.f32.mrb[15].mxu0 }
 0x5ff   : > { %v599_v38 = vpop.permute.xlu1 %598 }
 0x600   : > { %v609_v40 = vsel %vm155_vm1, %v955_v34, %v599_v38 }
 0x634   : > { %v603_v39 = vpop.permute.xlu0 %602 }
 0x635   : > { %v611_v41 = vsel %vm610_vm4, %v609_v40, %v603_v39 }
 0x63c   : > { %v607_v42 = vpop.permute.xlu1 %606 }
 0x63d   : > { %v613_v43 = vsel %vm612_vm5, %v611_v41, %v607_v42 }
 0x63e   : > { %v614_v44 = vpack.c.bf16 %v613_v43, %v613_v43 }
 0x640   : > { %616 = vst.msk [vmem:[%s142_s30] sm:$0xf] %vm615_vm6, %v614_v44 }
 0x641 PF: > { %s11_s8 = sadd.s32 1, %s852_s8   ;;  %s1005_s6 = smov %s848_s7 }
 0x642   : > { %p8_p5 = scmp.ge.s32.totalorder %s11_s8, 4   ;;  %s1006_s7 = smov %s1008_s9 }
 0x644   :  { %10 = sbr.rel (!%p8_p5) target bundleno = 2 (0x2), region = 54 }

// kernel: clip_text_forward.12
= control target key start
LH: loop header
LB: loop body
LE: loop exit
PB: predicated region body
PF: predicated region fallthrough
CT: control target
= control target key end

     0   :  { %vm37_vm0 = vcmask 261120   ;;  %v400_v19 = vmov 0.0   ;;  %vm401_vm1 = vmmov 0   ;;  %vm304_vm2 = vcmask 257024   ;;  %s503_s0 = inlined_call_operand.vmem [shape: bf16[16,32], index: 0, kind: input, shape index: {}]   ;;  %s504_s6 = inlined_call_operand.vmem [shape: f32[1,32], index: 6, kind: input, shape index: {}]   ;;  %s505_s3 = inlined_call_operand.vmem [shape: bf16[32,128], index: 3, kind: input, shape index: {}]   ;;  %s506_s1 = inlined_call_operand.vmem [shape: f32[1,32], index: 1, kind: input, shape index: {}]   ;;  %s507_s2 = inlined_call_operand.vmem [shape: f32[1,32], index: 2, kind: input, shape index: {}]   ;;  %s508_s5 = inlined_call_operand.vmem [shape: bf16[128,32], index: 5, kind: input, shape index: {}]   ;;  %s509_s4 = inlined_call_operand.vmem [shape: f32[1,128], index: 4, kind: input, shape index: {}]   ;;  %s510_s7 = inlined_call_operand.vmem [shape: bf16[16,32], index: 7, kind: output, shape index: {}]  }
   0x1   :  { %v333_v0 = vld [vmem:[%s503_s0] sm:$0xff]   ;;  %348 = vmatprep.subr.bf16.mxu0 %v400_v19  ;;  %356 = vmatprep.subr.bf16.mxu1 %v400_v19  ;;  %v379_v20 = vld [vmem:[%s505_s3 + $0x8] sm:$0xff]   ;;  %v382_v41 = vld [vmem:[%s508_s5 + $0x10] sm:$0xff]  }
   0x2   :  { %v313_v1 = vld [vmem:[%s504_s6] ss:$0 sm:$0xff]  ;;  %v334_v2 = vunpack.c.l.bf16 %v333_v0  ;;  %v335_v3 = vunpack.c.h.bf16 %v333_v0  ;;  %352 = vmatprep.mubr.msk.bf16.mxu0 %vm401_vm1, %v400_v19  ;;  %372 = vmatprep.mubr.msk.bf16.mxu1 %vm401_vm1, %v400_v19  ;;  %v381_v40 = vld [vmem:[%s508_s5 + $0x8] sm:$0xff]   ;;  %v383_v42 = vld [vmem:[%s508_s5 + $0x18] sm:$0xff]  }
   0x3   :  { %v378_v18 = vld [vmem:[%s505_s3] sm:$0xff]   ;;  %v385_v44 = vld [vmem:[%s508_s5 + $0x28] sm:$0xff]   ;;  %v386_v45 = vld [vmem:[%s508_s5 + $0x30] sm:$0xff]  }
   0x4   :  { %v38_v4 = vsel %vm37_vm0, %v334_v2, 0.0  ;;  %v90_v5 = vadd.f32 %v334_v2, %v313_v1  ;;  %v91_v6 = vadd.f32 %v335_v3, %v313_v1  ;;  %v41_v7 = vsel %vm37_vm0, %v335_v3, 0.0  ;;  %349 = vmatpush3.bf16.msra.mxu0 %v378_v18  ;;  %v311_v29 = vld [vmem:[%s506_s1] ss:$0 sm:$0xff]  ;;  %v387_v46 = vld [vmem:[%s508_s5 + $0x38] sm:$0xff]  }
   0x5   :  { %39 = vadd.xlane.f32.xlu0 %v38_v4  ;;  %350 = vmatprep.subr.bf16.mxu0 %v400_v19  ;;  %v312_v33 = vld [vmem:[%s507_s2] ss:$0 sm:$0xff] }
   0x6   :  { %92 = vst.msk [vmem:[#allocation3] sm:$0xff] %vm37_vm0, %v90_v5  ;;  %93 = vst.msk [vmem:[#allocation3 + $0x8] sm:$0xff] %vm37_vm0, %v91_v6  ;;  %v380_v39 = vld [vmem:[%s508_s5] sm:$0xff]  }
   0x7   :  { %357 = vmatpush3.bf16.msra.mxu1 %v380_v39  ;;  %v384_v43 = vld [vmem:[%s508_s5 + $0x20] sm:$0xff]  }
   0x8   :  { %351 = vmatpush3.bf16.msra.mxu0 %v379_v20  ;;  %358 = vmatprep.subr.bf16.mxu1 %v400_v19  ;;  %v314_v47 = vld [vmem:[%s509_s4] ss:$0 sm:$0xff] }
   0x9   :  { %42 = vadd.xlane.f32.xlu0 %v41_v7 }
   0xb   :  { %359 = vmatpush3.bf16.msra.mxu1 %v381_v40 }
   0xc   :  { %360 = vmatprep.subr.bf16.mxu1 %v400_v19 }
   0xd   :  { %v180_v5 = vld [vmem:[#allocation3 + $0x8] sm:$0xff] }
   0xf   :  { %361 = vmatpush3.bf16.msra.mxu1 %v382_v41 }
  0x10   :  { %362 = vmatprep.subr.bf16.mxu1 %v400_v19 }
  0x13   :  { %363 = vmatpush3.bf16.msra.mxu1 %v383_v42 }
  0x14   :  { %364 = vmatprep.subr.bf16.mxu1 %v400_v19 }
  0x17   :  { %365 = vmatpush3.bf16.msra.mxu1 %v384_v43 }
  0x18   :  { %366 = vmatprep.subr.bf16.mxu1 %v400_v19 }
  0x1b   :  { %367 = vmatpush3.bf16.msra.mxu1 %v385_v44 }
  0x1c   :  { %368 = vmatprep.subr.bf16.mxu1 %v400_v19 }
  0x1f   :  { %369 = vmatpush3.bf16.msra.mxu1 %v386_v45 }
  0x20   :  { %370 = vmatprep.subr.bf16.mxu1 %v400_v19 }
  0x23   :  { %371 = vmatpush3.bf16.msra.mxu1 %v387_v46 }
  0x92   :  { %v40_v8 = vpop.xlane.xlu0 %39 }
  0x93   :  { %v45_v9 = vmul.f32 0.03125, %v40_v8 }
  0x95   :  { %v47_v10 = vsub.f32 %v334_v2, %v45_v9 }
  0x96   :  { %v43_v11 = vpop.xlane.xlu0 %42 }
  0x97   :  { %v46_v12 = vmul.f32 0.03125, %v43_v11  ;;  %v49_v13 = vmul.f32 %v47_v10, %v47_v10 }
  0x99   :  { %v48_v14 = vsub.f32 %v335_v3, %v46_v12  ;;  %v51_v15 = vsel %vm37_vm0, %v49_v13, 0.0  ;;  %v179_v3 = vld [vmem:[#allocation3] sm:$0xff] }
  0x9a   :  { %52 = vadd.xlane.f32.xlu1 %v51_v15 }
  0x9b   :  { %v50_v16 = vmul.f32 %v48_v14, %v48_v14 }
  0x9d   :  { %v54_v17 = vsel %vm37_vm0, %v50_v16, 0.0 }
  0x9e   :  { %55 = vadd.xlane.f32.xlu1 %v54_v17 }
 0x127   :  { %v53_v21 = vpop.xlane.xlu1 %52 }
 0x128   :  { %v57_v22 = vmul.f32 0.03125, %v53_v21 }
 0x12a   :  { %v59_v23 = vadd.f32 1e-05, %v57_v22 }
 0x12b   :  { %v56_v24 = vpop.xlane.xlu1 %55 }
 0x12c   :  { %388 = vrsqrt.f32 %v59_v23  ;;  %v58_v25 = vmul.f32 0.03125, %v56_v24 }
 0x12e   :  { %v60_v26 = vadd.f32 1e-05, %v58_v25 }
 0x130   :  { %390 = vrsqrt.f32 %v60_v26 }
 0x136   :  { %v389_v27 = vpop.eup %388 }
 0x137   :  { %v63_v28 = vmul.f32 %v389_v27, %v47_v10 }
 0x139   :  { %v71_v31 = vmul.f32 %v311_v29, %v63_v28 }
 0x13a   :  { %v391_v30 = vpop.eup %390 }
 0x13b   :  { %v64_v32 = vmul.f32 %v391_v30, %v48_v14  ;;  %v79_v35 = vadd.f32 %v312_v33, %v71_v31 }
 0x13d   :  { %v72_v34 = vmul.f32 %v311_v29, %v64_v32 }
 0x13f   :  { %v80_v36 = vadd.f32 %v312_v33, %v72_v34 }
 0x141   :  { %v81_v37 = vpack.c.bf16 %v80_v36, %v79_v35 }
 0x143   :  { %82 = vst.msk [vmem:[#allocation2] sm:$0xff] %vm37_vm0, %v81_v37 }
 0x14a   :  { %v94_v38 = vld [vmem:[#allocation2] sm:$0xff] }
 0x14b   :  { %353 = vmatmul.mubr.msk.bf16.vlgmr.msra.gmra.mrb[0].mxu0 %vm37_vm0, %v94_v38 }
 0x21e   :  { %v156_v48 = vpop.f32.mrb[0].mxu0 }
 0x21f   :  { %v157_v49 = vadd.f32 %v314_v47, %v156_v48  ;;  %v354_v50 = vpop.f32.mrb[1].mxu0 }
 0x220   :  { %v159_v51 = vpop.f32.mrb[2].mxu0 }
 0x221   :  { %v318_v52 = vmul.f32 -1.702, %v157_v49  ;;  %v160_v53 = vadd.f32 %v314_v47, %v159_v51  ;;  %v355_v54 = vpop.f32.mrb[3].mxu0 }
 0x223   :  { %v167_v55 = vmul.f32 1.442695, %v318_v52  ;;  %v319_v56 = vmul.f32 -1.702, %v160_v53 }
 0x225   :  { %392 = vpow2.f32 %v167_v55  ;;  %v169_v57 = vmul.f32 1.442695, %v319_v56 }
 0x227   :  { %394 = vpow2.f32 %v169_v57 }
 0x22f   :  { %v393_v58 = vpop.eup %392 }
 0x230   :  { %v171_v59 = vadd.f32 1.0, %v393_v58 }
 0x231   :  { %v395_v60 = vpop.eup %394 }
 0x232   :  { %396 = vrcp.f32 %v171_v59  ;;  %v172_v61 = vadd.f32 1.0, %v395_v60 }
 0x234   :  { %398 = vrcp.f32 %v172_v61 }
 0x23c   :  { %v397_v62 = vpop.eup %396 }
 0x23d   :  { %v177_v0 = vmul.f32 %v397_v62, %v157_v49 }
 0x23e   :  { %v399_v63 = vpop.eup %398 }
 0x23f   :  { %v178_v1 = vmul.f32 %v399_v63, %v160_v53 }
 0x241   :  { %v181_v2 = vpack.c.bf16 %v178_v1, %v177_v0 }
 0x243   :  { %373 = vmatmul.mubr.bf16.vlgmr.msra.gmra.mrb[0].mxu1 %v181_v2 }
 0x316   :  { %v280_v4 = vpop.f32.mrb[0].mxu1 }
 0x317   :  { %v287_v6 = vadd.f32 %v280_v4, %v179_v3  ;;  %v374_v7 = vpop.f32.mrb[1].mxu1 }
 0x318   :  { %v283_v8 = vpop.f32.mrb[2].mxu1 }
 0x319   :  { %289 = vst.msk [vmem:[#allocation3] sm:$0xff] %vm37_vm0, %v287_v6  ;;  %v288_v9 = vadd.f32 %v283_v8, %v180_v5  ;;  %v375_v10 = vpop.f32.mrb[3].mxu1 }
 0x31b   :  { %290 = vst.msk [vmem:[#allocation3 + $0x8] sm:$0xff] %vm37_vm0, %v288_v9 }
 0x320   :  { %v294_v11 = vld [vmem:[#allocation3] sm:$0xff] }
 0x321   :  { %v330_v12 = vpack.c.bf16 %v294_v11, %v294_v11 }
 0x322   :  { %v295_v13 = vld [vmem:[#allocation3 + $0x8] sm:$0xff] }
 0x323   :  { %305 = vst.msk [vmem:[%s510_s7] sm:$0xf] %vm304_vm2, %v330_v12  ;;  %v331_v14 = vpack.c.bf16 %v295_v13, %v295_v13 }
 0x325   :  { %306 = vst.msk [vmem:[%s510_s7 + $0x4] sm:$0xf] %vm304_vm2, %v331_v14 }

// kernel: clip_text_forward.17
= control target key start
LH: loop header
LB: loop body
LE: loop exit
PB: predicated region body
PF: predicated region fallthrough
CT: control target
= control target key end

     0   :  { %vm21_vm0 = vcmask 261120   ;;  %s170_s0 = inlined_call_operand.vmem [shape: bf16[16,32], index: 0, kind: input, shape index: {}]   ;;  %s171_s1 = inlined_call_operand.vmem [shape: f32[1,32], index: 1, kind: input, shape index: {}]   ;;  %s172_s2 = inlined_call_operand.vmem [shape: f32[1,32], index: 2, kind: input, shape index: {}]   ;;  %s173_s3 = inlined_call_operand.hbm [shape: f32[16,32], index: 3, kind: output, shape index: {}]  }
   0x1   :  { %v86_v0 = vld [vmem:[%s170_s0] sm:$0xff]  }
   0x2   :  { %8 = vsyncpa [#allocation3], 0  ;;  %v87_v1 = vunpack.c.l.bf16 %v86_v0  ;;  %v88_v2 = vunpack.c.h.bf16 %v86_v0  ;;  %v83_v22 = vld [vmem:[%s171_s1] ss:$0 sm:$0xff]  ;;  %s120_s17 = smov [#allocation2]  }
   0x3   :  { %v84_v24 = vld [vmem:[%s172_s2] ss:$0 sm:$0xff]  ;;  %s72_s18 = sshll.u32 %s120_s17, 4  ;;  %s73_s18 = int_to_ptr.vmem [resolvable:$true] %s72_s18 }
   0x4   :  { %v22_v3 = vsel %vm21_vm0, %v87_v1, 0.0  ;;  %v25_v4 = vsel %vm21_vm0, %v88_v2, 0.0  ;;  %s96_s19 = scalar_lea.vmem %s73_s18, 256  ;;  %p101_p1 = scmp.lt.s32.totalorder %s73_s18, %s73_s18 }
   0x5   :  { %23 = vadd.xlane.f32.xlu0 %v22_v3  ;;  %p97_p0 = scmp.ne.s32.totalorder %s73_s18, %s96_s19  ;;  %p102_p2 = scmp.lt.s32.totalorder %s96_s19, %s96_s19 }
   0x7   :  { %p103_p3 = por %p102_p2, %p101_p1 }
   0x9   :  { %26 = vadd.xlane.f32.xlu0 %v25_v4  ;;  %p104_p4 = pnand %p103_p3, %p97_p0 }
  0x92   :  { %v24_v5 = vpop.xlane.xlu0 %23 }
  0x93   :  { %v29_v6 = vmul.f32 0.03125, %v24_v5 }
  0x95   :  { %v31_v7 = vsub.f32 %v87_v1, %v29_v6 }
  0x96   :  { %v27_v8 = vpop.xlane.xlu0 %26 }
  0x97   :  { %v30_v9 = vmul.f32 0.03125, %v27_v8  ;;  %v33_v10 = vmul.f32 %v31_v7, %v31_v7 }
  0x99   :  { %v32_v11 = vsub.f32 %v88_v2, %v30_v9  ;;  %v35_v12 = vsel %vm21_vm0, %v33_v10, 0.0 }
  0x9a   :  { %36 = vadd.xlane.f32.xlu1 %v35_v12 }
  0x9b   :  { %v34_v13 = vmul.f32 %v32_v11, %v32_v11 }
  0x9d   :  { %v38_v14 = vsel %vm21_vm0, %v34_v13, 0.0 }
  0x9e   :  { %39 = vadd.xlane.f32.xlu1 %v38_v14 }
 0x127   :  { %v37_v15 = vpop.xlane.xlu1 %36 }
 0x128   :  { %v41_v16 = vmul.f32 0.03125, %v37_v15 }
 0x12a   :  { %v43_v17 = vadd.f32 1e-05, %v41_v16 }
 0x12b   :  { %v40_v18 = vpop.xlane.xlu1 %39 }
 0x12c   :  { %92 = vrsqrt.f32 %v43_v17  ;;  %v42_v19 = vmul.f32 0.03125, %v40_v18 }
 0x12e   :  { %v44_v20 = vadd.f32 1e-05, %v42_v19 }
 0x130   :  { %94 = vrsqrt.f32 %v44_v20 }
 0x136   :  { %v93_v21 = vpop.eup %92 }
 0x137   :  { %v47_v23 = vmul.f32 %v93_v21, %v31_v7 }
 0x139   :  { %v55_v25 = vmul.f32 %v83_v22, %v47_v23 }
 0x13a   :  { %v95_v26 = vpop.eup %94 }
 0x13b   :  { %v48_v27 = vmul.f32 %v95_v26, %v32_v11  ;;  %v63_v28 = vadd.f32 %v84_v24, %v55_v25 }
 0x13d   :  { %v56_v29 = vmul.f32 %v83_v22, %v48_v27  ;;  %65 = vst.msk [vmem:[#allocation2] sm:$0xff] %vm21_vm0, %v63_v28 }
 0x13f   :  { %v64_v30 = vadd.f32 %v84_v24, %v56_v29 }
 0x141   :  { %66 = vst.msk [vmem:[#allocation2 + $0x8] sm:$0xff] %vm21_vm0, %v64_v30 }
 0x142   :  { %107 = shalt.err (!%p104_p4)
}
 0x143   :  { %s108_s20 = scalar_lea.hbm %s173_s3, 256 }
 0x144   :  { %p109_p5 = scmp.ne.s32.totalorder %s173_s3, %s108_s20  ;;  %p112_p6 = scmp.lt.u32.totalorder %s108_s20, %s173_s3 }
 0x146   :  { %p114_p7 = pnand %p112_p6, %p109_p5 }
 0x148   :  { %117 = shalt.err (!%p114_p7)
}
 0x149   :  { %s121_s25 = smov 128   ;;  %s122_s26 = smov 8  }
 0x14a   :  { %78 = dma.vmem_to_hbm [thread:$0]  %s73_s18, 256, %s173_s3, [#allocation3], %s121_s25, %s121_s25, %s122_s26  }
 0x14b   :  { %118 = dma.done.wait [#allocation3], 256  }
 0x14c   :  { %119 = vsyncadd [#allocation3], 4294967040 }
 0x14d   :  { %82 = vsyncpa [#allocation3], 1 }

</bundles_post_ra>
